<compile_context>
chip_gen: v7x
topology: tpu7x:2x2x1
jax: 0.10.0
libtpu: 0.0.40
codegen_flags: <defaults>
</compile_context>

<pallas_src>
import jax
import jax.numpy as jnp
from jax.experimental import pallas as pl
from jax.experimental.pallas import tpu as pltpu


NEG_SLOPE = 0.01      # PyTorch LeakyReLU default
BN_EPS = 1e-5         # PyTorch BatchNorm1d default
NEG_PAD = -1e30       # bias value for padded output logits (softmax mass = 0)


def _round_up(n, m):
    return ((n + m - 1) // m) * m


# ----------------------------------------------------------------------------
# Kernel
# ----------------------------------------------------------------------------
def _mlp_kernel(x_ref,
                w1, b1, w2, b2, w3, b3, w4, b4, w5, b5,
                out_ref, acc_ref):
    """K-tiled layer-1 accumulation + fused layers 2-5 and softmax epilogue."""
    k = pl.program_id(0)

    @pl.when(k == 0)
    def _():
        acc_ref[...] = jnp.zeros_like(acc_ref)

    # Layer-1 partial product for this K tile (bf16 weights upcast in-register).
    acc_ref[...] += jnp.dot(
        x_ref[...],
        w1[...].astype(jnp.float32),
        preferred_element_type=jnp.float32,
    )

    @pl.when(k == pl.num_programs(0) - 1)
    def _():
        def hidden(h, w_ref, b_ref):
            z = jnp.dot(h, w_ref[...].astype(jnp.float32),
                        preferred_element_type=jnp.float32) + b_ref[...]
            return jnp.where(z >= 0.0, z, NEG_SLOPE * z)

        # Finish layer 1 (bias already includes folded BN shift).
        z1 = acc_ref[...] + b1[...]
        h = jnp.where(z1 >= 0.0, z1, NEG_SLOPE * z1)

        h = hidden(h, w2, b2)
        h = hidden(h, w3, b3)
        h = hidden(h, w4, b4)

        logits = jnp.dot(h, w5[...].astype(jnp.float32),
                         preferred_element_type=jnp.float32) + b5[...]

        # Numerically stable softmax over dim=1.  Padded logit lanes carry a
        # -1e30 bias -> exp underflows to exactly 0 and they contribute nothing.
        m = jnp.max(logits, axis=1, keepdims=True)
        e = jnp.exp(logits - m)
        s = jnp.sum(e, axis=1, keepdims=True)
        inv = pl.reciprocal(s, approx=True)       # EUP, then Newton refine (VPU)
        inv = inv * (2.0 - s * inv)
        inv = inv * (2.0 - s * inv)
        out_ref[...] = (e * inv).astype(out_ref.dtype)


# ----------------------------------------------------------------------------
# Parameter / input preparation (parameter glue, outside the kernel)
# ----------------------------------------------------------------------------
def _fold_pad_cast_params(params, k_pad, weight_dtype=jnp.bfloat16):
    """Fold BN into Linear, zero-pad to 128-lane multiples, cast weights."""
    kargs = []
    prev_pad = k_pad
    # 4 hidden layers (Linear + BN).
    for (w, b, gamma, beta, mean, var) in params[:-1]:
        fan_in, fan_out = w.shape
        scale = gamma / jnp.sqrt(var + BN_EPS)
        shift = beta - mean * scale
        w = w * scale[None, :]
        b = b * scale + shift
        out_pad = _round_up(fan_out, 128)
        w = jnp.pad(w, ((0, prev_pad - fan_in), (0, out_pad - fan_out)))
        b = jnp.pad(b, (0, out_pad - fan_out))
        kargs += [w.astype(weight_dtype), b.reshape(1, -1).astype(jnp.float32)]
        prev_pad = out_pad
    # Output Linear: pad columns to 128 lanes; padded logits get -1e30 bias.
    w5, b5 = params[-1]
    fan_in, fan_out = w5.shape
    out_pad = _round_up(fan_out, 128)
    w5 = jnp.pad(w5, ((0, prev_pad - fan_in), (0, out_pad - fan_out)))
    b5 = jnp.pad(b5, (0, out_pad - fan_out), constant_values=NEG_PAD)
    kargs += [w5.astype(weight_dtype), b5.reshape(1, -1).astype(jnp.float32)]
    return kargs


def _prepare(x, params, tk_max=2048):
    """Pad batch to sublane multiple, choose K tile, pad K, prepare params."""
    batch, nb_input = x.shape
    b_pad = _round_up(batch, 8)
    tk_max = max(128, (tk_max // 128) * 128)          # lane-aligned tile size
    tk = min(tk_max, _round_up(nb_input, 128))
    k_pad = _round_up(nb_input, tk)
    xp = jnp.pad(x.astype(jnp.float32),
                 ((0, b_pad - batch), (0, k_pad - nb_input)))
    kargs = _fold_pad_cast_params(params, k_pad)
    return xp, kargs, tk, k_pad // tk


# ----------------------------------------------------------------------------
# Forward
# ----------------------------------------------------------------------------
def basemodel_forward(x, params, *, tk_max=2048):
    batch = x.shape[0]
    nb_output = params[-1][0].shape[1]
    xp, kargs, tk, num_k = _prepare(x, params, tk_max)
    b_pad = xp.shape[0]
    h1_pad = kargs[0].shape[1]
    out_pad = kargs[-1].shape[1]

    in_specs = [
        pl.BlockSpec((b_pad, tk), lambda k: (0, k)),      # x : K-tiled
        pl.BlockSpec((tk, h1_pad), lambda k: (k, 0)),     # W1: K-tiled, streamed
    ]
    # Remaining (small) weights / biases: full arrays, resident across K steps.
    in_specs += [pl.BlockSpec(a.shape, lambda k: (0, 0)) for a in kargs[1:]]

    out = pl.pallas_call(
        _mlp_kernel,
        out_shape=jax.ShapeDtypeStruct((b_pad, out_pad), jnp.float32),
        grid_spec=pltpu.PrefetchScalarGridSpec(
            num_scalar_prefetch=0,
            grid=(num_k,),
            in_specs=in_specs,
            out_specs=pl.BlockSpec((b_pad, out_pad), lambda k: (0, 0)),
            scratch_shapes=[pltpu.VMEM((b_pad, h1_pad), jnp.float32)],
        ),
        compiler_params=pltpu.CompilerParams(
            dimension_semantics=("arbitrary",),          # K is a reduction axis
            vmem_limit_bytes=32 * 1024 * 1024,           # safe on v5e/v6e/v7x
        ),
    )(xp, *kargs)
    return out[:batch, :nb_output]


# ----------------------------------------------------------------------------
# References
# ----------------------------------------------------------------------------
def basemodel_reference(x, params):
    """Pure-JAX fp32 eval-mode forward matching the PyTorch module exactly."""
    h = x.astype(jnp.float32)
    for (w, b, gamma, beta, mean, var) in params[:-1]:
        z = h @ w + b
        z = (z - mean) / jnp.sqrt(var + BN_EPS) * gamma + beta
        h = jnp.where(z >= 0.0, z, NEG_SLOPE * z)
    w5, b5 = params[-1]
    logits = h @ w5 + b5
    return jax.nn.softmax(logits, axis=1)


def reference_from_prepared(xp, kargs, batch, nb_output):
    """fp32 forward over the exact folded/padded/bf16 weights the kernel sees."""
    h = xp
    for i in range(4):
        w = kargs[2 * i].astype(jnp.float32)
        b = kargs[2 * i + 1]
        z = h @ w + b
        h = jnp.where(z >= 0.0, z, NEG_SLOPE * z)
    logits = h @ kargs[8].astype(jnp.float32) + kargs[9]
    return jax.nn.softmax(logits, axis=1)[:batch, :nb_output]


# ----------------------------------------------------------------------------
# Parameter init (mirrors PyTorch default init and shapes)
# ----------------------------------------------------------------------------
def init_params(key, nb_input=512, nb_output=11):
    dims = [nb_input, 500, 200, 100, 50, nb_output]
    params = []
    for i in range(5):
        fan_in, fan_out = dims[i], dims[i + 1]
        key, kw, kb = jax.random.split(key, 3)
        bound = 1.0 / jnp.sqrt(jnp.float32(fan_in))
        w = jax.random.uniform(kw, (fan_in, fan_out), jnp.float32, -bound, bound)
        b = jax.random.uniform(kb, (fan_out,), jnp.float32, -bound, bound)
        if i < 4:  # hidden layers carry BatchNorm1d
            gamma = jnp.ones((fan_out,), jnp.float32)
            beta = jnp.zeros((fan_out,), jnp.float32)
            running_mean = jnp.zeros((fan_out,), jnp.float32)
            running_var = jnp.ones((fan_out,), jnp.float32)
            params.append((w, b, gamma, beta, running_mean, running_var))
        else:
            params.append((w, b))
    return params


if __name__ == "__main__":
    key = jax.random.PRNGKey(0)
    k_params, k_x = jax.random.split(key)

    # Small stand-in shapes (real model: nb_input=32043). Non-multiple sizes
    # plus a small tk_max exercise the K-tiling, padding and batch-pad paths.
    batch = 6
    nb_input = 1000
    nb_output = 11
    tk_max = 256   # -> K padded to 1024, grid of 4 K-steps

    params = init_params(k_params, nb_input=nb_input, nb_output=nb_output)
    x = jax.random.normal(k_x, (batch, nb_input), jnp.float32)

    out = basemodel_forward(x, params, tk_max=tk_max)
    out = jax.block_until_ready(out)
    assert out.shape == (batch, nb_output)

    # Tight check: same folded/padded/bf16 weights, fp32 math (plumbing check).
    xp, kargs, _, _ = _prepare(x, params, tk_max=tk_max)
    tight_ref = reference_from_prepared(xp, kargs, batch, nb_output)
    assert jnp.allclose(out, tight_ref, atol=1e-5, rtol=1e-5), \
        "mismatch vs prepared-weight reference"

    # Semantic check vs the exact PyTorch eval-mode fp32 math; tolerance covers
    # the deliberate bf16 weight storage.
    sem_ref = basemodel_reference(x, params)
    assert jnp.allclose(out, sem_ref, atol=1e-2), "mismatch vs fp32 semantics"

    assert jnp.allclose(jnp.sum(out, axis=1), 1.0, atol=1e-4), \
        "softmax rows must sum to 1"

    print("KERNEL_OK")
</pallas_src>

<mosaic_0001>
module attributes {stable_mosaic.version = 11 : i64} {
  func.func @_mlp_kernel(%arg0: i32, %arg1: memref<8x256xf32, #tpu.memory_space<vmem>>, %arg2: memref<256x512xbf16, #tpu.memory_space<vmem>>, %arg3: memref<1x512xf32, #tpu.memory_space<vmem>>, %arg4: memref<512x256xbf16, #tpu.memory_space<vmem>>, %arg5: memref<1x256xf32, #tpu.memory_space<vmem>>, %arg6: memref<256x128xbf16, #tpu.memory_space<vmem>>, %arg7: memref<1x128xf32, #tpu.memory_space<vmem>>, %arg8: memref<128x128xbf16, #tpu.memory_space<vmem>>, %arg9: memref<1x128xf32, #tpu.memory_space<vmem>>, %arg10: memref<128x128xbf16, #tpu.memory_space<vmem>>, %arg11: memref<1x128xf32, #tpu.memory_space<vmem>>, %arg12: memref<8x128xf32, #tpu.memory_space<vmem>>, %arg13: memref<8x512xf32, #tpu.memory_space<vmem>>) attributes {dimension_semantics = [#tpu.dimension_semantics<arbitrary>], iteration_bounds = array<i64: 4>, scalar_prefetch = 0 : i64, scratch_operands = 1 : i64, tpu.core_type = #tpu.core_type<tc>, window_params = [{transform_indices = @transform_0, window_bounds = array<i64: 8, 256>}, {transform_indices = @transform_1, window_bounds = array<i64: 256, 512>}, {pipeline_mode = #tpu.pipeline_mode<synchronous>, transform_indices = @transform_2, window_bounds = array<i64: 1, 512>}, {pipeline_mode = #tpu.pipeline_mode<synchronous>, transform_indices = @transform_3, window_bounds = array<i64: 512, 256>}, {pipeline_mode = #tpu.pipeline_mode<synchronous>, transform_indices = @transform_4, window_bounds = array<i64: 1, 256>}, {pipeline_mode = #tpu.pipeline_mode<synchronous>, transform_indices = @transform_5, window_bounds = array<i64: 256, 128>}, {pipeline_mode = #tpu.pipeline_mode<synchronous>, transform_indices = @transform_6, window_bounds = array<i64: 1, 128>}, {pipeline_mode = #tpu.pipeline_mode<synchronous>, transform_indices = @transform_7, window_bounds = array<i64: 128, 128>}, {pipeline_mode = #tpu.pipeline_mode<synchronous>, transform_indices = @transform_8, window_bounds = array<i64: 1, 128>}, {pipeline_mode = #tpu.pipeline_mode<synchronous>, transform_indices = @transform_9, window_bounds = array<i64: 128, 128>}, {pipeline_mode = #tpu.pipeline_mode<synchronous>, transform_indices = @transform_10, window_bounds = array<i64: 1, 128>}, {pipeline_mode = #tpu.pipeline_mode<synchronous>, transform_indices = @transform_11, window_bounds = array<i64: 8, 128>}]} {
    %c0_i32 = arith.constant 0 : i32
    %0 = arith.cmpi eq, %arg0, %c0_i32 : i32
    %1 = arith.extui %0 : i1 to i32
    %c0_i32_0 = arith.constant 0 : i32
    %2 = arith.cmpi ne, %1, %c0_i32_0 : i32
    scf.if %2 {
      %cst_9 = arith.constant 0.000000e+00 : f32
      %13 = vector.broadcast %cst_9 : f32 to vector<8x512xf32>
      %c0_10 = arith.constant 0 : index
      %c0_11 = arith.constant 0 : index
      %14 = vector.load %arg13[%c0_10, %c0_11] : memref<8x512xf32, #tpu.memory_space<vmem>>, vector<8x512xf32>
      tpu.vector_store %arg13[%c0_10, %c0_11], %13 {strides = array<i32>} : memref<8x512xf32, #tpu.memory_space<vmem>>, vector<8x512xf32>,
    } else {
    }
    %c0 = arith.constant 0 : index
    %c0_1 = arith.constant 0 : index
    %3 = vector.load %arg13[%c0, %c0_1] : memref<8x512xf32, #tpu.memory_space<vmem>>, vector<8x512xf32>
    %c0_2 = arith.constant 0 : index
    %c0_3 = arith.constant 0 : index
    %4 = vector.load %arg1[%c0_2, %c0_3] : memref<8x256xf32, #tpu.memory_space<vmem>>, vector<8x256xf32>
    %c0_4 = arith.constant 0 : index
    %c0_5 = arith.constant 0 : index
    %5 = vector.load %arg2[%c0_4, %c0_5] : memref<256x512xbf16, #tpu.memory_space<vmem>>, vector<256x512xbf16>
    %6 = arith.extf %5 : vector<256x512xbf16> to vector<256x512xf32>
    %cst = arith.constant dense<0.000000e+00> : vector<8x512xf32>
    %7 = tpu.matmul %4, %6, %cst {dimension_numbers = #tpu.dot_dimension_numbers<[1], [0], [0], [1], [0, 0, 1, 1], [], []>} : vector<8x256xf32>, vector<256x512xf32>, vector<8x512xf32> -> vector<8x512xf32>
    %8 = arith.addf %3, %7 : vector<8x512xf32>
    %c0_6 = arith.constant 0 : index
    %c0_7 = arith.constant 0 : index
    %9 = vector.load %arg13[%c0_6, %c0_7] : memref<8x512xf32, #tpu.memory_space<vmem>>, vector<8x512xf32>
    tpu.vector_store %arg13[%c0_6, %c0_7], %8 {strides = array<i32>} : memref<8x512xf32, #tpu.memory_space<vmem>>, vector<8x512xf32>,
    %c3_i32 = arith.constant 3 : i32
    %10 = arith.cmpi eq, %arg0, %c3_i32 : i32
    %11 = arith.extui %10 : i1 to i32
    %c0_i32_8 = arith.constant 0 : i32
    %12 = arith.cmpi ne, %11, %c0_i32_8 : i32
    scf.if %12 {
      %c0_9 = arith.constant 0 : index
      %c0_10 = arith.constant 0 : index
      %13 = vector.load %arg13[%c0_9, %c0_10] : memref<8x512xf32, #tpu.memory_space<vmem>>, vector<8x512xf32>
      %c0_11 = arith.constant 0 : index
      %c0_12 = arith.constant 0 : index
      %14 = vector.load %arg3[%c0_11, %c0_12] : memref<1x512xf32, #tpu.memory_space<vmem>>, vector<1x512xf32>
      %15 = vector.broadcast %14 : vector<1x512xf32> to vector<8x512xf32>
      %16 = arith.addf %13, %15 : vector<8x512xf32>
      %cst_13 = arith.constant 0.000000e+00 : f32
      %17 = vector.broadcast %cst_13 : f32 to vector<8x512xf32>
      %18 = arith.cmpf oge, %16, %17 : vector<8x512xf32>
      %cst_14 = arith.constant 0.00999999977 : f32
      %19 = vector.broadcast %cst_14 : f32 to vector<8x512xf32>
      %20 = arith.mulf %19, %16 : vector<8x512xf32>
      %21 = arith.select %18, %16, %20 : vector<8x512xi1>, vector<8x512xf32>
      %c0_15 = arith.constant 0 : index
      %c0_16 = arith.constant 0 : index
      %22 = vector.load %arg4[%c0_15, %c0_16] : memref<512x256xbf16, #tpu.memory_space<vmem>>, vector<512x256xbf16>
      %23 = arith.extf %22 : vector<512x256xbf16> to vector<512x256xf32>
      %cst_17 = arith.constant dense<0.000000e+00> : vector<8x256xf32>
      %24 = tpu.matmul %21, %23, %cst_17 {dimension_numbers = #tpu.dot_dimension_numbers<[1], [0], [0], [1], [0, 0, 1, 1], [], []>} : vector<8x512xf32>, vector<512x256xf32>, vector<8x256xf32> -> vector<8x256xf32>
      %c0_18 = arith.constant 0 : index
      %c0_19 = arith.constant 0 : index
      %25 = vector.load %arg5[%c0_18, %c0_19] : memref<1x256xf32, #tpu.memory_space<vmem>>, vector<1x256xf32>
      %26 = vector.broadcast %25 : vector<1x256xf32> to vector<8x256xf32>
      %27 = arith.addf %24, %26 : vector<8x256xf32>
      %cst_20 = arith.constant 0.000000e+00 : f32
      %28 = vector.broadcast %cst_20 : f32 to vector<8x256xf32>
      %29 = arith.cmpf oge, %27, %28 : vector<8x256xf32>
      %cst_21 = arith.constant 0.00999999977 : f32
      %30 = vector.broadcast %cst_21 : f32 to vector<8x256xf32>
      %31 = arith.mulf %30, %27 : vector<8x256xf32>
      %32 = arith.select %29, %27, %31 : vector<8x256xi1>, vector<8x256xf32>
      %c0_22 = arith.constant 0 : index
      %c0_23 = arith.constant 0 : index
      %33 = vector.load %arg6[%c0_22, %c0_23] : memref<256x128xbf16, #tpu.memory_space<vmem>>, vector<256x128xbf16>
      %34 = arith.extf %33 : vector<256x128xbf16> to vector<256x128xf32>
      %cst_24 = arith.constant dense<0.000000e+00> : vector<8x128xf32>
      %35 = tpu.matmul %32, %34, %cst_24 {dimension_numbers = #tpu.dot_dimension_numbers<[1], [0], [0], [1], [0, 0, 1, 1], [], []>} : vector<8x256xf32>, vector<256x128xf32>, vector<8x128xf32> -> vector<8x128xf32>
      %c0_25 = arith.constant 0 : index
      %c0_26 = arith.constant 0 : index
      %36 = vector.load %arg7[%c0_25, %c0_26] : memref<1x128xf32, #tpu.memory_space<vmem>>, vector<1x128xf32>
      %37 = vector.broadcast %36 : vector<1x128xf32> to vector<8x128xf32>
      %38 = arith.addf %35, %37 : vector<8x128xf32>
      %cst_27 = arith.constant 0.000000e+00 : f32
      %39 = vector.broadcast %cst_27 : f32 to vector<8x128xf32>
      %40 = arith.cmpf oge, %38, %39 : vector<8x128xf32>
      %cst_28 = arith.constant 0.00999999977 : f32
      %41 = vector.broadcast %cst_28 : f32 to vector<8x128xf32>
      %42 = arith.mulf %41, %38 : vector<8x128xf32>
      %43 = arith.select %40, %38, %42 : vector<8x128xi1>, vector<8x128xf32>
      %c0_29 = arith.constant 0 : index
      %c0_30 = arith.constant 0 : index
      %44 = vector.load %arg8[%c0_29, %c0_30] : memref<128x128xbf16, #tpu.memory_space<vmem>>, vector<128x128xbf16>
      %45 = arith.extf %44 : vector<128x128xbf16> to vector<128x128xf32>
      %cst_31 = arith.constant dense<0.000000e+00> : vector<8x128xf32>
      %46 = tpu.matmul %43, %45, %cst_31 {dimension_numbers = #tpu.dot_dimension_numbers<[1], [0], [0], [1], [0, 0, 1, 1], [], []>} : vector<8x128xf32>, vector<128x128xf32>, vector<8x128xf32> -> vector<8x128xf32>
      %c0_32 = arith.constant 0 : index
      %c0_33 = arith.constant 0 : index
      %47 = vector.load %arg9[%c0_32, %c0_33] : memref<1x128xf32, #tpu.memory_space<vmem>>, vector<1x128xf32>
      %48 = vector.broadcast %47 : vector<1x128xf32> to vector<8x128xf32>
      %49 = arith.addf %46, %48 : vector<8x128xf32>
      %cst_34 = arith.constant 0.000000e+00 : f32
      %50 = vector.broadcast %cst_34 : f32 to vector<8x128xf32>
      %51 = arith.cmpf oge, %49, %50 : vector<8x128xf32>
      %cst_35 = arith.constant 0.00999999977 : f32
      %52 = vector.broadcast %cst_35 : f32 to vector<8x128xf32>
      %53 = arith.mulf %52, %49 : vector<8x128xf32>
      %54 = arith.select %51, %49, %53 : vector<8x128xi1>, vector<8x128xf32>
      %c0_36 = arith.constant 0 : index
      %c0_37 = arith.constant 0 : index
      %55 = vector.load %arg10[%c0_36, %c0_37] : memref<128x128xbf16, #tpu.memory_space<vmem>>, vector<128x128xbf16>
      %56 = arith.extf %55 : vector<128x128xbf16> to vector<128x128xf32>
      %cst_38 = arith.constant dense<0.000000e+00> : vector<8x128xf32>
      %57 = tpu.matmul %54, %56, %cst_38 {dimension_numbers = #tpu.dot_dimension_numbers<[1], [0], [0], [1], [0, 0, 1, 1], [], []>} : vector<8x128xf32>, vector<128x128xf32>, vector<8x128xf32> -> vector<8x128xf32>
      %c0_39 = arith.constant 0 : index
      %c0_40 = arith.constant 0 : index
      %58 = vector.load %arg11[%c0_39, %c0_40] : memref<1x128xf32, #tpu.memory_space<vmem>>, vector<1x128xf32>
      %59 = vector.broadcast %58 : vector<1x128xf32> to vector<8x128xf32>
      %60 = arith.addf %57, %59 : vector<8x128xf32>
      %cst_41 = arith.constant dense<0xFF800000> : vector<8xf32>
      %61 = vector.multi_reduction <maximumf>, %60, %cst_41 [1] : vector<8x128xf32> to vector<8xf32>
      %62 = vector.shape_cast %61 : vector<8xf32> to vector<8x1xf32>
      %63 = vector.broadcast %62 : vector<8x1xf32> to vector<8x128xf32>
      %64 = arith.subf %60, %63 : vector<8x128xf32>
      %65 = math.exp %64 : vector<8x128xf32>
      %cst_42 = arith.constant dense<0.000000e+00> : vector<8xf32>
      %66 = vector.multi_reduction <add>, %65, %cst_42 [1] : vector<8x128xf32> to vector<8xf32>
      %67 = vector.shape_cast %66 : vector<8xf32> to vector<8x1xf32>
      %68 = tpu.reciprocal %67 {approx = true} : vector<8x1xf32> -> vector<8x1xf32>
      %69 = arith.mulf %67, %68 : vector<8x1xf32>
      %cst_43 = arith.constant 2.000000e+00 : f32
      %70 = vector.broadcast %cst_43 : f32 to vector<8x1xf32>
      %71 = arith.subf %70, %69 : vector<8x1xf32>
      %72 = arith.mulf %68, %71 : vector<8x1xf32>
      %73 = arith.mulf %67, %72 : vector<8x1xf32>
      %cst_44 = arith.constant 2.000000e+00 : f32
      %74 = vector.broadcast %cst_44 : f32 to vector<8x1xf32>
      %75 = arith.subf %74, %73 : vector<8x1xf32>
      %76 = arith.mulf %72, %75 : vector<8x1xf32>
      %77 = vector.broadcast %76 : vector<8x1xf32> to vector<8x128xf32>
      %78 = arith.mulf %65, %77 : vector<8x128xf32>
      %c0_45 = arith.constant 0 : index
      %c0_46 = arith.constant 0 : index
      %79 = vector.load %arg12[%c0_45, %c0_46] : memref<8x128xf32, #tpu.memory_space<vmem>>, vector<8x128xf32>
      tpu.vector_store %arg12[%c0_45, %c0_46], %78 {strides = array<i32>} : memref<8x128xf32, #tpu.memory_space<vmem>>, vector<8x128xf32>,
    } else {
    }
    return
  }
  func.func @transform_0(%arg0: i32) -> (i32, i32) {
    %c0_i32 = arith.constant 0 : i32
    %c0_i32_0 = arith.constant 0 : i32
    return %c0_i32, %arg0 : i32, i32
  }
  func.func @transform_1(%arg0: i32) -> (i32, i32) {
    %c0_i32 = arith.constant 0 : i32
    %c0_i32_0 = arith.constant 0 : i32
    return %arg0, %c0_i32 : i32, i32
  }
  func.func @transform_2(%arg0: i32) -> (i32, i32) {
    %c0_i32 = arith.constant 0 : i32
    %c0_i32_0 = arith.constant 0 : i32
    %c0_i32_1 = arith.constant 0 : i32
    return %c0_i32, %c0_i32_0 : i32, i32
  }
  func.func @transform_3(%arg0: i32) -> (i32, i32) {
    %c0_i32 = arith.constant 0 : i32
    %c0_i32_0 = arith.constant 0 : i32
    %c0_i32_1 = arith.constant 0 : i32
    return %c0_i32, %c0_i32_0 : i32, i32
  }
  func.func @transform_4(%arg0: i32) -> (i32, i32) {
    %c0_i32 = arith.constant 0 : i32
    %c0_i32_0 = arith.constant 0 : i32
    %c0_i32_1 = arith.constant 0 : i32
    return %c0_i32, %c0_i32_0 : i32, i32
  }
  func.func @transform_5(%arg0: i32) -> (i32, i32) {
    %c0_i32 = arith.constant 0 : i32
    %c0_i32_0 = arith.constant 0 : i32
    %c0_i32_1 = arith.constant 0 : i32
    return %c0_i32, %c0_i32_0 : i32, i32
  }
  func.func @transform_6(%arg0: i32) -> (i32, i32) {
    %c0_i32 = arith.constant 0 : i32
    %c0_i32_0 = arith.constant 0 : i32
    %c0_i32_1 = arith.constant 0 : i32
    return %c0_i32, %c0_i32_0 : i32, i32
  }
  func.func @transform_7(%arg0: i32) -> (i32, i32) {
    %c0_i32 = arith.constant 0 : i32
    %c0_i32_0 = arith.constant 0 : i32
    %c0_i32_1 = arith.constant 0 : i32
    return %c0_i32, %c0_i32_0 : i32, i32
  }
  func.func @transform_8(%arg0: i32) -> (i32, i32) {
    %c0_i32 = arith.constant 0 : i32
    %c0_i32_0 = arith.constant 0 : i32
    %c0_i32_1 = arith.constant 0 : i32
    return %c0_i32, %c0_i32_0 : i32, i32
  }
  func.func @transform_9(%arg0: i32) -> (i32, i32) {
    %c0_i32 = arith.constant 0 : i32
    %c0_i32_0 = arith.constant 0 : i32
    %c0_i32_1 = arith.constant 0 : i32
    return %c0_i32, %c0_i32_0 : i32, i32
  }
  func.func @transform_10(%arg0: i32) -> (i32, i32) {
    %c0_i32 = arith.constant 0 : i32
    %c0_i32_0 = arith.constant 0 : i32
    %c0_i32_1 = arith.constant 0 : i32
    return %c0_i32, %c0_i32_0 : i32, i32
  }
  func.func @transform_11(%arg0: i32) -> (i32, i32) {
    %c0_i32 = arith.constant 0 : i32
    %c0_i32_0 = arith.constant 0 : i32
    %c0_i32_1 = arith.constant 0 : i32
    return %c0_i32, %c0_i32_0 : i32, i32
  }
}

</mosaic_0001>

<bundles_post_ra>
// kernel: tpu_custom_call.1
= control target key start
LH: loop header
LB: loop body
LE: loop exit
PB: predicated region body
PF: predicated region fallthrough
CT: control target
= control target key end

     0   :  { %s3596_s0 = inlined_call_operand.hbm [shape: f32[8,1024], index: 0, kind: input, shape index: {}]   ;;  %s3597_s1 = inlined_call_operand.hbm [shape: bf16[1024,512], index: 1, kind: input, shape index: {}]   ;;  %s3598_s2 = inlined_call_operand.vmem [shape: f32[1,512], index: 2, kind: input, shape index: {}]   ;;  %s3599_s3 = inlined_call_operand.hbm [shape: bf16[512,256], index: 3, kind: input, shape index: {}]   ;;  %s3600_s4 = inlined_call_operand.vmem [shape: f32[1,256], index: 4, kind: input, shape index: {}]   ;;  %s3601_s5 = inlined_call_operand.hbm [shape: bf16[256,128], index: 5, kind: input, shape index: {}]   ;;  %s3602_s6 = inlined_call_operand.vmem [shape: f32[1,128], index: 6, kind: input, shape index: {}]   ;;  %s3603_s7 = inlined_call_operand.hbm [shape: bf16[128,128], index: 7, kind: input, shape index: {}]   ;;  %s3604_s8 = inlined_call_operand.vmem [shape: f32[1,128], index: 8, kind: input, shape index: {}]   ;;  %s3605_s9 = inlined_call_operand.hbm [shape: bf16[128,128], index: 9, kind: input, shape index: {}]   ;;  %s3606_s10 = inlined_call_operand.vmem [shape: f32[1,128], index: 10, kind: input, shape index: {}]   ;;  %s3607_s11 = inlined_call_operand.hbm [shape: f32[8,128], index: 11, kind: output, shape index: {}]  }
   0x1   :  { %3611 = sst [smem:[#allocation21_spill]] %s3596_s0 }
   0x2   :  { %3612 = sst [smem:[#allocation22_spill]] %s3604_s8 }
   0x3   :  { %3613 = sst [smem:[#allocation23_spill]] %s3606_s10 }
   0x4   :  { %3614 = sst [smem:[#allocation24_spill]] %s3607_s11 }
   0x5   :  { %16 = vsyncpa [#allocation4], 0 }
   0x6   :  { %18 = vsyncpa [#allocation4 + $0x1], 0 }
   0x7   :  { %19 = vsyncpa [#allocation7], 0 }
   0x8   :  { %21 = vsyncpa [#allocation7 + $0x1], 0 }
   0x9   :  { %22 = vsyncpa [#allocation10], 0 }
   0xa   :  { %23 = vsyncpa [#allocation13], 0 }
   0xb   :  { %24 = vsyncpa [#allocation5], 0  ;;  %s3171_s17 = smov 0   ;;  %s3173_s18 = smov 0  }
   0xc   :  { %s3175_s19 = smov 0   ;;  %s3177_s20 = smov 0  }
   0xd LB: > { %s3094_s21 = smov [#allocation8]   ;;  %s3192_s23 = sadd.s32 4294967295, %s3092_s20   ;;  %s3092_s20 = sphi %s3177_s20, %s3636_s20   ;;  %s3088_s19 = sphi %s3175_s19, %s3635_s19   ;;  %s3084_s18 = sphi %s3173_s18, %s3634_s18   ;;  %s3080_s17 = sphi %s3171_s17, %s3633_s17  }
   0xe   : > { %s312_s22 = sshll.u32 %s3094_s21, 4  ;;  %p1746_p0 = scmp.ge.s32.totalorder %s3092_s20, 1  ;;  %s3198_s22 = int_to_ptr.vmem [resolvable:$true] %s312_s22 }
   0xf   : > { %p3609_p1 = scmp.eq.s32.totalorder %s3192_s23, 0  ;;  %p297_p2 = scmp.lt.s32.totalorder %s3092_s20, 5 }
  0x10   : > { %s3095_s25 = smov [#allocation9]   ;;  %s3096_s28 = smov [#allocation11]  }
  0x11   : > { %p3200_p4 = pnand %p1746_p0, %p297_p2  ;;  %s328_s26 = sshll.u32 %s3095_s25, 4  ;;  %s3212_s26 = int_to_ptr.vmem [resolvable:$true] %s328_s26 }
  0x12   : > { %s3214_s29 = sshll.u32 %s3096_s28, 4  ;;  %s2840_s13 = scalar_lea.hbm %s3599_s3, 8192  ;;  %s345_s29 = int_to_ptr.vmem [resolvable:$true] %s3214_s29 }
  0x13   : > { %s3615_s24 = scalar_select %p3200_p4, 1, 0 }
  0x14   : > { %p2566_p5 = pneg %p3200_p4  ;;  %p2841_p7 = scmp.ne.s32.totalorder %s3599_s3, %s2840_s13 }
  0x15   : > { %p2847_p11 = scmp.lt.u32.totalorder %s2840_s13, %s3599_s3 }
  0x16   : > { %p3208_p6 = pnand %p2566_p5, %p3609_p1 }
  0x18   : > { %p3224_p8 = pneg %p3208_p6 }
  0x1a   : > { %p2843_p9 = pnand %p3224_p8, %p2841_p7 }
  0x1c   : > { %p2844_p10 = pneg %p2843_p9 }
  0x1e   : > { %p2849_p12 = pnand %p2847_p11, %p2844_p10 }
  0x20   : > { %2852 = shalt.err (!%p2849_p12)
}
  0x21   : > { %s2853_s28 = scalar_lea.vmem %s3198_s22, 8192  ;;  %p2861_p5 = scmp.lt.s32.totalorder %s3198_s22, %s3198_s22 }
  0x22   : > { %p2854_p13 = scmp.ne.s32.totalorder %s3198_s22, %s2853_s28  ;;  %p2862_p3 = scmp.lt.s32.totalorder %s2853_s28, %s2853_s28 }
  0x24   : > { %p2856_p0 = pnand %p2854_p13, %p3224_p8  ;;  %p2863_p7 = por %p2862_p3, %p2861_p5 }
  0x26   : > { %p2857_p2 = pneg %p2856_p0 }
  0x28   : > { %p2864_p9 = pnand %p2863_p7, %p2857_p2 }
  0x2a   : > { %2867 = shalt.err (!%p2864_p9)
}
  0x2b   : > { %s3097_s30 = smov 128   ;;  %s3098_s12 = smov 8  }
  0x2c   : > { %2569 = dma.hbm_to_vmem [thread:$0]  (!%p3208_p6), %s3599_s3, 8192, %s3198_s22, [#allocation7], %s3097_s30, %s3097_s30, %s3098_s12  }
  0x2d   : > { %s2868_s25 = scalar_lea.hbm %s3601_s5, 2048 }
  0x2e   : > { %p2869_p3 = scmp.ne.s32.totalorder %s3601_s5, %s2868_s25  ;;  %p2875_p12 = scmp.lt.u32.totalorder %s2868_s25, %s3601_s5 }
  0x30   : > { %p2871_p10 = pnand %p2869_p3, %p3224_p8 }
  0x32   : > { %p2872_p11 = pneg %p2871_p10 }
  0x34   : > { %p2877_p13 = pnand %p2875_p12, %p2872_p11 }
  0x36   : > { %2880 = shalt.err (!%p2877_p13)
}
  0x37   : > { %s2881_s22 = scalar_lea.vmem %s3212_s26, 2048  ;;  %p2889_p7 = scmp.lt.s32.totalorder %s3212_s26, %s3212_s26 }
  0x38   : > { %p2882_p0 = scmp.ne.s32.totalorder %s3212_s26, %s2881_s22  ;;  %p2890_p9 = scmp.lt.s32.totalorder %s2881_s22, %s2881_s22 }
  0x3a   : > { %p2884_p2 = pnand %p2882_p0, %p3224_p8  ;;  %p2891_p3 = por %p2890_p9, %p2889_p7 }
  0x3c   : > { %p2885_p5 = pneg %p2884_p2 }
  0x3e   : > { %p2892_p10 = pnand %p2891_p3, %p2885_p5 }
  0x40   : > { %2895 = shalt.err (!%p2892_p10)
}
  0x41   : > { %s3099_s10 = smov 64   ;;  %s3100_s8 = smov 4  }
  0x42   : > { %2572 = dma.hbm_to_vmem [thread:$0]  (!%p3208_p6), %s3601_s5, 2048, %s3212_s26, [#allocation10], %s3099_s10, %s3099_s10, %s3100_s8  }
  0x43   : > { %s2896_s14 = scalar_lea.hbm %s3603_s7, 1024 }
  0x44   : > { %p2897_p11 = scmp.ne.s32.totalorder %s3603_s7, %s2896_s14  ;;  %p2903_p0 = scmp.lt.u32.totalorder %s2896_s14, %s3603_s7 }
  0x46   : > { %p2899_p12 = pnand %p2897_p11, %p3224_p8 }
  0x48   : > { %p2900_p13 = pneg %p2899_p12 }
  0x4a   : > { %p2905_p2 = pnand %p2903_p0, %p2900_p13 }
  0x4c   : > { %2908 = shalt.err (!%p2905_p2)
}
  0x4d   : > { %s2909_s22 = scalar_lea.vmem %s345_s29, 1024  ;;  %p2917_p3 = scmp.lt.s32.totalorder %s345_s29, %s345_s29 }
  0x4e   : > { %p2910_p5 = scmp.ne.s32.totalorder %s345_s29, %s2909_s22  ;;  %p2918_p10 = scmp.lt.s32.totalorder %s2909_s22, %s2909_s22 }
  0x50   : > { %p2912_p7 = pnand %p2910_p5, %p3224_p8  ;;  %p2919_p1 = por %p2918_p10, %p2917_p3 }
  0x52   : > { %p2913_p9 = pneg %p2912_p7 }
  0x54   : > { %p2920_p4 = pnand %p2919_p1, %p2913_p9 }
  0x56   : > { %2923 = shalt.err (!%p2920_p4)
}
  0x57   : > { %2575 = dma.hbm_to_vmem [thread:$0]  (!%p3208_p6), %s3603_s7, 1024, %s345_s29, [#allocation10], %s3099_s10, %s3099_s10, %s3100_s8  }
  0x58   : > { %s3101_s30 = smov [#allocation12]   ;;  %s2924_s15 = scalar_lea.hbm %s3605_s9, 1024 }
  0x59   : > { %s360_s12 = sshll.u32 %s3101_s30, 4  ;;  %p2925_p1 = scmp.ne.s32.totalorder %s3605_s9, %s2924_s15  ;;  %s361_s12 = int_to_ptr.vmem [resolvable:$true] %s360_s12 }
  0x5a   : > { %p2931_p12 = scmp.lt.u32.totalorder %s2924_s15, %s3605_s9 }
  0x5b   : > { %p2927_p4 = pnand %p2925_p1, %p3224_p8 }
  0x5d   : > { %p2928_p11 = pneg %p2927_p4 }
  0x5f   : > { %p2933_p13 = pnand %p2931_p12, %p2928_p11 }
  0x61   : > { %2936 = shalt.err (!%p2933_p13)
}
  0x62   : > { %s2937_s29 = scalar_lea.vmem %s361_s12, 1024  ;;  %p2945_p7 = scmp.lt.s32.totalorder %s361_s12, %s361_s12 }
  0x63   : > { %p2938_p0 = scmp.ne.s32.totalorder %s361_s12, %s2937_s29  ;;  %p2946_p9 = scmp.lt.s32.totalorder %s2937_s29, %s2937_s29 }
  0x65   : > { %p2940_p2 = pnand %p2938_p0, %p3224_p8  ;;  %p2947_p3 = por %p2946_p9, %p2945_p7 }
  0x67   : > { %p2941_p5 = pneg %p2940_p2 }
  0x69   : > { %p2948_p10 = pnand %p2947_p3, %p2941_p5 }
  0x6b   : > { %2951 = shalt.err (!%p2948_p10)
}
  0x6c   : > { %2578 = dma.hbm_to_vmem [thread:$0]  (!%p3208_p6), %s3605_s9, 1024, %s361_s12, [#allocation13], %s3099_s10, %s3099_s10, %s3100_s8  }
  0x6d   : > { %s3315_s27 = sadd.s32 1, %s3092_s20   ;;  %s37_s16 = sadd.s32 1, %s3088_s19 }
  0x6e   : > { %s34_s30 = ssub.s32 %s3092_s20, %s3315_s27  ;;  %p44_p8 = scmp.ne.s32.totalorder %s3088_s19, %s3084_s18 }
  0x6f   : > { %p35_p1 = scmp.eq.s32.totalorder %s34_s30, 0  ;;  %p45_p4 = scmp.eq.s32.totalorder %s3092_s20, 0 }
  0x70   : > { %p50_p11 = scmp.ne.s32.totalorder %s3084_s18, %s3080_s17  ;;  %p2590_p12 = scmp.lt.s32.totalorder %s3092_s20, 4 }
  0x71   : > { %s3327_s13 = scalar_select %p35_p1, %s3088_s19, %s37_s16  }
  0x72   : > { %p46_p13 = por %p45_p4, %p44_p8  ;;  %p3618_p0 = scmp.eq.s32.totalorder %s3192_s23, 0 }
  0x73   : > { %s3336_s15 = sand.u32 1, %s3088_s19   ;;  %s1775_s10 = sshll.u32 %s3092_s20, 8 }
  0x74   : > { %p3331_p2 = por %p3618_p0, %p50_p11  ;;  %s1752_s8 = sshll.u32 %s3336_s15, 4 }
  0x75   : > { %s3620_s0 = sld [smem:[#allocation21_spill]]  ;;  %s381_s25 = scalar_lea.vmem [#allocation3], %s1752_s8 }
  0x76   : > { %s389_s28 = sshll.u32 %s381_s25, 4  ;;  %p3345_p6 = pnand %p2590_p12, %p46_p13  ;;  %s3349_s28 = int_to_ptr.vmem [resolvable:$true] %s389_s28 }
  0x77   : > { %s1755_s29 = sshll.u32 %s3336_s15, 9  ;;  %s378_s26 = scalar_lea.sflag [#allocation4], %s3336_s15 }
  0x78   : > { %p2954_p7 = pneg %p3345_p6 }
  0x7b   : > { %s3343_s17 = scalar_lea.hbm %s3620_s0, %s1775_s10  ;;  %s2957_s10 = scalar_lea.hbm %s3620_s0, 1024 }
  0x7c   : > { %s2952_s11 = scalar_lea.hbm %s3343_s17, 256  ;;  %p2958_p10 = scmp.lt.u32.totalorder %s3343_s17, %s3620_s0 }
  0x7d   : > { %p2953_p5 = scmp.ne.s32.totalorder %s3343_s17, %s2952_s11  ;;  %p2959_p8 = scmp.lt.u32.totalorder %s2957_s10, %s2952_s11 }
  0x7e   : > { %p2961_p4 = scmp.lt.u32.totalorder %s2952_s11, %s3343_s17 }
  0x7f   : > { %p2955_p9 = pnand %p2954_p7, %p2953_p5  ;;  %p2960_p1 = por %p2959_p8, %p2958_p10 }
  0x81   : > { %p2956_p3 = pneg %p2955_p9  ;;  %p2962_p11 = por %p2961_p4, %p2960_p1 }
  0x83   : > { %p2963_p12 = pnand %p2962_p11, %p2956_p3 }
  0x85   : > { %2966 = shalt.err (!%p2963_p12)
}
  0x86   : > { %s2967_s21 = scalar_lea.vmem %s3349_s28, 256  ;;  %s3102_s25 = smov [#allocation3]  }
  0x87   : > { %p2968_p13 = scmp.ne.s32.totalorder %s3349_s28, %s2967_s21  ;;  %s2972_s16 = sshll.u32 %s3102_s25, 4  ;;  %s2973_s16 = int_to_ptr.vmem [resolvable:$false] %s2972_s16 }
  0x88   : > { %s2974_s30 = scalar_lea.vmem %s2973_s16, 512  ;;  %p2975_p9 = scmp.lt.s32.totalorder %s3349_s28, %s2973_s16 }
  0x89   : > { %p2970_p0 = pnand %p2968_p13, %p2954_p7  ;;  %p2976_p10 = scmp.lt.s32.totalorder %s2974_s30, %s2967_s21 }
  0x8b   : > { %p2971_p5 = pneg %p2970_p0  ;;  %p2977_p8 = por %p2976_p10, %p2975_p9 }
  0x8d   : > { %p2978_p1 = pnand %p2977_p8, %p2971_p5 }
  0x8f   : > { %2981 = shalt.err (!%p2978_p1)
}
  0x90   : > { %2582 = dma.hbm_to_vmem [thread:$0]  (!%p3345_p6), %s3343_s17, 256, %s3349_s28, %s378_s26  }
  0x91   : > { %s400_s11 = scalar_lea.vmem [#allocation6], %s1755_s29  ;;  %s396_s8 = sand.u32 1, %s3092_s20  }
  0x92   : > { %s408_s10 = sshll.u32 %s400_s11, 4  ;;  %s1777_s12 = sshll.u32 %s3092_s20, 13  ;;  %s3381_s10 = int_to_ptr.vmem [resolvable:$true] %s408_s10 }
  0x93   : > { %s3387_s16 = scalar_lea.hbm %s3597_s1, %s1777_s12  ;;  %s3389_s30 = scalar_lea.sflag [#allocation7], %s396_s8 }
  0x94   : > { %s2982_s0 = scalar_lea.hbm %s3387_s16, 8192  ;;  %s2987_s20 = scalar_lea.hbm %s3597_s1, 32768 }
  0x95   : > { %p2983_p3 = scmp.ne.s32.totalorder %s3387_s16, %s2982_s0  ;;  %p2988_p12 = scmp.lt.u32.totalorder %s3387_s16, %s3597_s1 }
  0x96   : > { %p2989_p13 = scmp.lt.u32.totalorder %s2987_s20, %s2982_s0  ;;  %p2991_p5 = scmp.lt.u32.totalorder %s2982_s0, %s3387_s16 }
  0x97   : > { %p2985_p4 = pnand %p2983_p3, %p2954_p7 }
  0x98   : > { %p2990_p0 = por %p2989_p13, %p2988_p12 }
  0x99   : > { %p2986_p11 = pneg %p2985_p4 }
  0x9a   : > { %p2992_p9 = por %p2991_p5, %p2990_p0 }
  0x9c   : > { %p2993_p10 = pnand %p2992_p9, %p2986_p11 }
  0x9e   : > { %2996 = shalt.err (!%p2993_p10)
}
  0x9f   : > { %s2997_s26 = scalar_lea.vmem %s3381_s10, 8192  ;;  %s3103_s11 = smov [#allocation6]  }
  0xa0   : > { %p2998_p8 = scmp.ne.s32.totalorder %s3381_s10, %s2997_s26  ;;  %s3002_s8 = sshll.u32 %s3103_s11, 4  ;;  %s3003_s8 = int_to_ptr.vmem [resolvable:$false] %s3002_s8 }
  0xa1   : > { %s3004_s12 = scalar_lea.vmem %s3003_s8, 16384  ;;  %p3005_p4 = scmp.lt.s32.totalorder %s3381_s10, %s3003_s8 }
  0xa2   : > { %p3000_p1 = pnand %p2998_p8, %p2954_p7  ;;  %p3006_p12 = scmp.lt.s32.totalorder %s3004_s12, %s2997_s26 }
  0xa4   : > { %p3001_p3 = pneg %p3000_p1  ;;  %p3007_p13 = por %p3006_p12, %p3005_p4 }
  0xa6   : > { %p3008_p0 = pnand %p3007_p13, %p3001_p3 }
  0xa8   : > { %3011 = shalt.err (!%p3008_p0)
}
  0xa9   : > { %s3104_s0 = smov 256   ;;  %s3105_s21 = smov 16  }
  0xaa   : > { %2585 = dma.hbm_to_vmem [thread:$0]  (!%p3345_p6), %s3387_s16, 8192, %s3381_s10, %s3389_s30, %s3104_s0, %s3104_s0, %s3105_s21  }
  0xab   : > { %p3622_p7 = scmp.ne.s32.totalorder %s3615_s24, 0 }
  0xac   : > { %s422_s25 = sand.u32 (!%p3622_p7), 1, %s3084_s18  }
  0xad   : > { %420 = sbr.rel (%p3622_p7) target bundleno = 1786 (0x6fa), region = 64  ;;  %s1760_s15 = sshll.u32 (!%p3622_p7), %s422_s25, 4 }
  0xae   : > { %s423_s17 = scalar_lea.sflag (!%p3622_p7), [#allocation4], %s422_s25  ;;  %s3418_s20 = scalar_lea.vmem (!%p3622_p7), [#allocation3], %s1760_s15 }
  0xb4   : > { %3055 = dma.done.wait (%p3331_p2), %s423_s17, 256  }
  0xb5   : > { %3057 = vsyncadd (%p3331_p2), %s423_s17, 4294967040  ;;  %s431_s28 = sand.u32 1, %s3192_s23   ;;  %s1761_s22 = sshll.u32 %s422_s25, 9 }
  0xb6   : > { %s432_s10 = scalar_lea.sflag [#allocation7], %s431_s28  ;;  %s3425_s16 = scalar_lea.vmem [#allocation6], %s1761_s22 }
  0xb7   : > { %3059 = dma.done.wait (%p3331_p2), %s432_s10, 8192  }
  0xb8   : > { %3061 = vsyncadd (%p3331_p2), %s432_s10, 4294959104  ;;  %p3623_p6 = scmp.eq.s32.totalorder %s3192_s23, 0 }
  0xba   : > { %3063 = dma.done.wait (%p3623_p6), [#allocation7], 8192   ;;  %p3624_p11 = pmov %p3623_p6 }
  0xbb   : > { %p3625_p5 = pmov %p3623_p6 }
  0xbc   : > { %3065 = vsyncadd (%p3624_p11), [#allocation7], 4294959104 }
  0xbd   : > { %3067 = dma.done.wait (%p3625_p5), [#allocation10], 3072   ;;  %p3626_p9 = pmov %p3625_p5 }
  0xbe   : > { %p3627_p10 = pmov %p3625_p5 }
  0xbf   : > { %3069 = vsyncadd (%p3626_p9), [#allocation10], 4294964224 }
  0xc0   : > { %3071 = dma.done.wait (%p3627_p10), [#allocation13], 1024   ;;  %p3628_p8 = pmov %p3625_p5 }
  0xc1   : > { %p3629_p2 = scmp.ne.s32.totalorder %s3192_s23, 0 }
  0xc2   : > { %3073 = vsyncadd (%p3628_p8), [#allocation13], 4294966272  ;;  %v3106_v0 = vmov (!%p3629_p2), 0.0  }
  0xc3   : > { %495 = sbr.rel (%p3629_p2) target bundleno = 202 (0xca), region = 92  ;;  %496 = vst [vmem:[#allocation2] sm:$0xff] (!%p3629_p2), %v3106_v0  ;;  %497 = vst [vmem:[#allocation2 + $0x8] sm:$0xff] (!%p3629_p2), %v3106_v0 }
  0xc4   : > { %498 = vst [vmem:[#allocation2 + $0x10] sm:$0xff] (!%p3629_p2), %v3106_v0  ;;  %499 = vst [vmem:[#allocation2 + $0x18] sm:$0xff] (!%p3629_p2), %v3106_v0 }
  0xca PF: > { %v2644_v1 = vld [vmem:[%s3425_s16 + $0x4] ss:$16 sps:$4 sm:$0xff]   ;;  %v2646_v2 = vld [vmem:[%s3425_s16 + $0xc] ss:$16 sps:$4 sm:$0xff]   ;;  %v2648_v3 = vld [vmem:[%s3425_s16] ss:$16 sps:$4 sm:$0xff]  }
  0xcb   : > { %2075 = vmatprep.subr.bf16.mxu0 %v2644_v1  ;;  %v2649_v4 = vld [vmem:[%s3425_s16 + $0x8] ss:$16 sps:$4 sm:$0xff]   ;;  %2139 = vmatprep.subr.bf16.mxu1 %v2646_v2  ;;  %v2650_v5 = vld [vmem:[%s3425_s16 + $0x24] ss:$16 sps:$4 sm:$0xff]   ;;  %v2652_v6 = vld [vmem:[%s3425_s16 + $0x2c] ss:$16 sps:$4 sm:$0xff]  }
  0xcc   : > { %2077 = vmatpush1.bf16.msra.mxu0 %v2648_v3  ;;  %2141 = vmatpush1.bf16.msra.mxu1 %v2649_v4  ;;  %v2654_v7 = vld [vmem:[%s3425_s16 + $0x20] ss:$16 sps:$4 sm:$0xff]   ;;  %v2655_v8 = vld [vmem:[%s3425_s16 + $0x28] ss:$16 sps:$4 sm:$0xff]   ;;  %v2656_v9 = vld [vmem:[%s3425_s16 + $0x44] ss:$16 sps:$4 sm:$0xff]  }
  0xcd   : > { %2079 = vmatprep.subr.bf16.mxu0 %v2650_v5  ;;  %2143 = vmatprep.subr.bf16.mxu1 %v2652_v6  ;;  %v2658_v10 = vld [vmem:[%s3425_s16 + $0x4c] ss:$16 sps:$4 sm:$0xff]   ;;  %v2660_v11 = vld [vmem:[%s3425_s16 + $0x40] ss:$16 sps:$4 sm:$0xff]   ;;  %v2661_v12 = vld [vmem:[%s3425_s16 + $0x48] ss:$16 sps:$4 sm:$0xff]  }
  0xce   : > { %v2662_v13 = vld [vmem:[%s3425_s16 + $0x64] ss:$16 sps:$4 sm:$0xff]   ;;  %v2664_v14 = vld [vmem:[%s3425_s16 + $0x6c] ss:$16 sps:$4 sm:$0xff]   ;;  %v2666_v15 = vld [vmem:[%s3425_s16 + $0x60] ss:$16 sps:$4 sm:$0xff]  }
  0xcf   : > { %v2667_v16 = vld [vmem:[%s3425_s16 + $0x68] ss:$16 sps:$4 sm:$0xff]   ;;  %v2668_v17 = vld [vmem:[%s3425_s16 + $0x84] ss:$16 sps:$4 sm:$0xff]   ;;  %v2670_v18 = vld [vmem:[%s3425_s16 + $0x8c] ss:$16 sps:$4 sm:$0xff]  }
  0xd0   : > { %2081 = vmatpush1.bf16.msra.mxu0 %v2654_v7  ;;  %2145 = vmatpush1.bf16.msra.mxu1 %v2655_v8  ;;  %v2672_v19 = vld [vmem:[%s3425_s16 + $0x80] ss:$16 sps:$4 sm:$0xff]   ;;  %v2673_v20 = vld [vmem:[%s3425_s16 + $0x88] ss:$16 sps:$4 sm:$0xff]   ;;  %v2674_v21 = vld [vmem:[%s3425_s16 + $0xa4] ss:$16 sps:$4 sm:$0xff]  }
  0xd1   : > { %2083 = vmatprep.subr.bf16.mxu0 %v2656_v9  ;;  %2147 = vmatprep.subr.bf16.mxu1 %v2658_v10  ;;  %v2676_v22 = vld [vmem:[%s3425_s16 + $0xac] ss:$16 sps:$4 sm:$0xff]   ;;  %v2678_v23 = vld [vmem:[%s3425_s16 + $0xa0] ss:$16 sps:$4 sm:$0xff]   ;;  %v2679_v24 = vld [vmem:[%s3425_s16 + $0xa8] ss:$16 sps:$4 sm:$0xff]  }
  0xd2   : > { %v2680_v25 = vld [vmem:[%s3425_s16 + $0xc4] ss:$16 sps:$4 sm:$0xff]   ;;  %v2682_v26 = vld [vmem:[%s3425_s16 + $0xcc] ss:$16 sps:$4 sm:$0xff]   ;;  %v2684_v27 = vld [vmem:[%s3425_s16 + $0xc0] ss:$16 sps:$4 sm:$0xff]  }
  0xd3   : > { %v2685_v28 = vld [vmem:[%s3425_s16 + $0xc8] ss:$16 sps:$4 sm:$0xff]   ;;  %v2686_v29 = vld [vmem:[%s3425_s16 + $0xe4] ss:$16 sps:$4 sm:$0xff]   ;;  %v2688_v30 = vld [vmem:[%s3425_s16 + $0xec] ss:$16 sps:$4 sm:$0xff]  }
  0xd4   : > { %2085 = vmatpush1.bf16.msra.mxu0 %v2660_v11  ;;  %2149 = vmatpush1.bf16.msra.mxu1 %v2661_v12  ;;  %v2690_v31 = vld [vmem:[%s3425_s16 + $0xe0] ss:$16 sps:$4 sm:$0xff]   ;;  %v2691_v32 = vld [vmem:[%s3425_s16 + $0xe8] ss:$16 sps:$4 sm:$0xff]   ;;  %v2692_v33 = vld [vmem:[%s3425_s16 + $0x104] ss:$16 sps:$4 sm:$0xff]  }
  0xd5   : > { %2087 = vmatprep.subr.bf16.mxu0 %v2662_v13  ;;  %2151 = vmatprep.subr.bf16.mxu1 %v2664_v14  ;;  %v2694_v34 = vld [vmem:[%s3425_s16 + $0x10c] ss:$16 sps:$4 sm:$0xff]   ;;  %v2696_v35 = vld [vmem:[%s3425_s16 + $0x100] ss:$16 sps:$4 sm:$0xff]   ;;  %v2697_v36 = vld [vmem:[%s3425_s16 + $0x108] ss:$16 sps:$4 sm:$0xff]  }
  0xd6   : > { %v2698_v37 = vld [vmem:[%s3425_s16 + $0x124] ss:$16 sps:$4 sm:$0xff]   ;;  %v2700_v38 = vld [vmem:[%s3425_s16 + $0x12c] ss:$16 sps:$4 sm:$0xff]   ;;  %v2702_v39 = vld [vmem:[%s3425_s16 + $0x120] ss:$16 sps:$4 sm:$0xff]  }
  0xd7   : > { %v2703_v40 = vld [vmem:[%s3425_s16 + $0x128] ss:$16 sps:$4 sm:$0xff]   ;;  %v2704_v41 = vld [vmem:[%s3425_s16 + $0x144] ss:$16 sps:$4 sm:$0xff]   ;;  %v2706_v42 = vld [vmem:[%s3425_s16 + $0x14c] ss:$16 sps:$4 sm:$0xff]  }
  0xd8   : > { %2089 = vmatpush1.bf16.msra.mxu0 %v2666_v15  ;;  %2153 = vmatpush1.bf16.msra.mxu1 %v2667_v16  ;;  %v2708_v43 = vld [vmem:[%s3425_s16 + $0x140] ss:$16 sps:$4 sm:$0xff]   ;;  %v2709_v44 = vld [vmem:[%s3425_s16 + $0x148] ss:$16 sps:$4 sm:$0xff]   ;;  %v2710_v45 = vld [vmem:[%s3425_s16 + $0x164] ss:$16 sps:$4 sm:$0xff]  }
  0xd9   : > { %2091 = vmatprep.subr.bf16.mxu0 %v2668_v17  ;;  %2155 = vmatprep.subr.bf16.mxu1 %v2670_v18  ;;  %v2712_v46 = vld [vmem:[%s3425_s16 + $0x16c] ss:$16 sps:$4 sm:$0xff]   ;;  %v2714_v48 = vld [vmem:[%s3425_s16 + $0x160] ss:$16 sps:$4 sm:$0xff]   ;;  %v2715_v49 = vld [vmem:[%s3425_s16 + $0x168] ss:$16 sps:$4 sm:$0xff]  }
  0xda   : > { %v505_v47 = vld [vmem:[%s3418_s20 + $0x8] sm:$0xff]  ;;  %v2716_v50 = vld [vmem:[%s3425_s16 + $0x184] ss:$16 sps:$4 sm:$0xff]   ;;  %v2720_v52 = vld [vmem:[%s3425_s16 + $0x180] ss:$16 sps:$4 sm:$0xff]   ;;  %p1767_p1 = scmp.ne.s32.totalorder %s3192_s23, 3 }
  0xdb   : > { %762 = vmatprep.mubr.f32.mxu0 %v505_v47  ;;  %833 = vmatprep.mubr.f32.mxu1 %v505_v47  ;;  %v2718_v51 = vld [vmem:[%s3425_s16 + $0x18c] ss:$16 sps:$4 sm:$0xff]   ;;  %v2721_v53 = vld [vmem:[%s3425_s16 + $0x188] ss:$16 sps:$4 sm:$0xff]   ;;  %v2722_v54 = vld [vmem:[%s3425_s16 + $0x1a4] ss:$16 sps:$4 sm:$0xff]  }
  0xdc   : > { %2093 = vmatpush1.bf16.msra.mxu0 %v2672_v19  ;;  %2157 = vmatpush1.bf16.msra.mxu1 %v2673_v20  ;;  %v2724_v55 = vld [vmem:[%s3425_s16 + $0x1ac] ss:$16 sps:$4 sm:$0xff]   ;;  %v2726_v56 = vld [vmem:[%s3425_s16 + $0x1a0] ss:$16 sps:$4 sm:$0xff]   ;;  %v2727_v57 = vld [vmem:[%s3425_s16 + $0x1a8] ss:$16 sps:$4 sm:$0xff]  }
  0xdd   : > { %2095 = vmatprep.subr.bf16.mxu0 %v2674_v21  ;;  %2159 = vmatprep.subr.bf16.mxu1 %v2676_v22  ;;  %v2728_v58 = vld [vmem:[%s3425_s16 + $0x1c4] ss:$16 sps:$4 sm:$0xff]   ;;  %v2730_v59 = vld [vmem:[%s3425_s16 + $0x1cc] ss:$16 sps:$4 sm:$0xff]   ;;  %v2732_v60 = vld [vmem:[%s3425_s16 + $0x1c0] ss:$16 sps:$4 sm:$0xff]   ;;  %v858_v22 = vlaneseq (!%p1767_p1) }
  0xde   : > { %v2733_v61 = vld [vmem:[%s3425_s16 + $0x1c8] ss:$16 sps:$4 sm:$0xff]   ;;  %v2734_v62 = vld [vmem:[%s3425_s16 + $0x1e4] ss:$16 sps:$4 sm:$0xff]   ;;  %v2736_v63 = vld [vmem:[%s3425_s16 + $0x1ec] ss:$16 sps:$4 sm:$0xff]  }
  0xdf   : > { %v2738_v0 = vld [vmem:[%s3425_s16 + $0x1e0] ss:$16 sps:$4 sm:$0xff]   ;;  %v2739_v1 = vld [vmem:[%s3425_s16 + $0x1e8] ss:$16 sps:$4 sm:$0xff]   ;;  %v2740_v15 = vld [vmem:[#allocation8 + $0x4] ss:$8 sps:$4 sm:$0xff] (!%p1767_p1)  }
  0xe0   : > { %2097 = vmatpush1.bf16.msra.mxu0 %v2678_v23  ;;  %2161 = vmatpush1.bf16.msra.mxu1 %v2679_v24  ;;  %v504_v2 = vld [vmem:[%s3418_s20] sm:$0xff]  ;;  %v501_v5 = vld [vmem:[#allocation2 + $0x8] sm:$0xff]  ;;  %v503_v6 = vld [vmem:[#allocation2 + $0x18] sm:$0xff]  ;;  %vm3108_vm6 = vmmov (!%p1767_p1), 0   ;;  %s3630_s0 = sld [smem:[#allocation22_spill]] (!%p1767_p1)  ;;  %s3631_s15 = sld [smem:[#allocation23_spill]] (!%p1767_p1) }
  0xe1   : > { %2099 = vmatprep.subr.bf16.mxu0 %v2680_v25  ;;  %2163 = vmatprep.subr.bf16.mxu1 %v2682_v26  ;;  %v500_v3 = vld [vmem:[#allocation2] sm:$0xff]  ;;  %v502_v4 = vld [vmem:[#allocation2 + $0x10] sm:$0xff]  ;;  %v3512_v25 = vshrl.u32 (!%p1767_p1), %v858_v22, 7 }
  0xe2   : > { %v2742_v16 = vld [vmem:[#allocation8] ss:$8 sps:$4 sm:$0xff] (!%p1767_p1)   ;;  %v2743_v17 = vld [vmem:[#allocation8 + $0x14] ss:$8 sps:$4 sm:$0xff] (!%p1767_p1)   ;;  %v2745_v18 = vld [vmem:[#allocation8 + $0x10] ss:$8 sps:$4 sm:$0xff] (!%p1767_p1)  }
  0xe3   : > { %v2746_v19 = vld [vmem:[#allocation8 + $0x24] ss:$8 sps:$4 sm:$0xff] (!%p1767_p1)   ;;  %v2748_v20 = vld [vmem:[#allocation8 + $0x20] ss:$8 sps:$4 sm:$0xff] (!%p1767_p1)   ;;  %v2749_v21 = vld [vmem:[#allocation8 + $0x34] ss:$8 sps:$4 sm:$0xff] (!%p1767_p1)  }
  0xe4   : > { %2101 = vmatpush1.bf16.msra.mxu0 %v2684_v27  ;;  %2165 = vmatpush1.bf16.msra.mxu1 %v2685_v28  ;;  %v2751_v23 = vld [vmem:[#allocation8 + $0x30] ss:$8 sps:$4 sm:$0xff] (!%p1767_p1)   ;;  %v2752_v24 = vld [vmem:[#allocation8 + $0x44] ss:$8 sps:$4 sm:$0xff] (!%p1767_p1)   ;;  %v2754_v26 = vld [vmem:[#allocation8 + $0x40] ss:$8 sps:$4 sm:$0xff] (!%p1767_p1)  }
  0xe5   : > { %2103 = vmatprep.subr.bf16.mxu0 %v2686_v29  ;;  %2167 = vmatprep.subr.bf16.mxu1 %v2688_v30  ;;  %v2755_v27 = vld [vmem:[#allocation8 + $0x54] ss:$8 sps:$4 sm:$0xff] (!%p1767_p1)   ;;  %v864_v28 = vsub.s32 (!%p1767_p1), 1, %v3512_v25  ;;  %v868_v29 = vsub.s32 (!%p1767_p1), 2, %v3512_v25  ;;  %v2757_v30 = vld [vmem:[#allocation8 + $0x50] ss:$8 sps:$4 sm:$0xff] (!%p1767_p1)  }
  0xe6   : > { %v2772_v47 = vld [vmem:[#allocation8 + $0xa0] ss:$8 sps:$4 sm:$0xff] (!%p1767_p1)   ;;  %v2794_v22 = vld [vmem:[#allocation8 + $0x124] ss:$8 sps:$4 sm:$0xff] (!%p1767_p1)  }
  0xe8   : > { %2105 = vmatpush1.bf16.msra.mxu0 %v2690_v31  ;;  %2169 = vmatpush1.bf16.msra.mxu1 %v2691_v32  ;;  %v2758_v31 = vld [vmem:[#allocation8 + $0x64] ss:$8 sps:$4 sm:$0xff] (!%p1767_p1)  }
  0xe9   : > { %2107 = vmatprep.subr.bf16.mxu0 %v2692_v33  ;;  %2171 = vmatprep.subr.bf16.mxu1 %v2694_v34  ;;  %v856_v33 = vld [vmem:[%s3598_s2] sm:$0xf] (!%p1767_p1) }
  0xea   : > { %v865_v34 = vrot.slane (!%p1767_p1), %v856_v33, %v864_v28 }
  0xec   : > { %2109 = vmatpush1.bf16.msra.mxu0 %v2696_v35  ;;  %2173 = vmatpush1.bf16.msra.mxu1 %v2697_v36  ;;  %v3521_v35 = vrot.slane (!%p1767_p1), %v856_v33, %v868_v29  ;;  %v2760_v36 = vld [vmem:[#allocation8 + $0x60] ss:$8 sps:$4 sm:$0xff] (!%p1767_p1)  }
  0xed   : > { %2111 = vmatprep.subr.bf16.mxu0 %v2698_v37  ;;  %2175 = vmatprep.subr.bf16.mxu1 %v2700_v38  ;;  %v2761_v37 = vld [vmem:[#allocation8 + $0x74] ss:$8 sps:$4 sm:$0xff] (!%p1767_p1)   ;;  %v2802_v29 = vld [vmem:[#allocation8 + $0x140] ss:$8 sps:$4 sm:$0xff] (!%p1767_p1)  }
  0xf0   : > { %2113 = vmatpush1.bf16.msra.mxu0 %v2702_v39  ;;  %2177 = vmatpush1.bf16.msra.mxu1 %v2703_v40  ;;  %v2763_v40 = vld [vmem:[#allocation8 + $0x70] ss:$8 sps:$4 sm:$0xff] (!%p1767_p1)  }
  0xf1   : > { %2115 = vmatprep.subr.bf16.mxu0 %v2704_v41  ;;  %2179 = vmatprep.subr.bf16.mxu1 %v2706_v42  ;;  %v2764_v41 = vld [vmem:[#allocation8 + $0x84] ss:$8 sps:$4 sm:$0xff] (!%p1767_p1)  }
  0xf4   : > { %2117 = vmatpush1.bf16.msra.mxu0 %v2708_v43  ;;  %2181 = vmatpush1.bf16.msra.mxu1 %v2709_v44  ;;  %v2766_v43 = vld [vmem:[#allocation8 + $0x80] ss:$8 sps:$4 sm:$0xff] (!%p1767_p1)   ;;  %v2767_v44 = vld [vmem:[#allocation8 + $0x94] ss:$8 sps:$4 sm:$0xff] (!%p1767_p1)  }
  0xf5   : > { %2119 = vmatprep.subr.bf16.mxu0 %v2710_v45  ;;  %2183 = vmatprep.subr.bf16.mxu1 %v2712_v46  ;;  %v2769_v45 = vld [vmem:[#allocation8 + $0x90] ss:$8 sps:$4 sm:$0xff] (!%p1767_p1)   ;;  %v2770_v46 = vld [vmem:[#allocation8 + $0xa4] ss:$8 sps:$4 sm:$0xff] (!%p1767_p1)  }
  0xf8   : > { %2121 = vmatpush1.bf16.msra.mxu0 %v2714_v48  ;;  %2185 = vmatpush1.bf16.msra.mxu1 %v2715_v49  ;;  %v2773_v48 = vld [vmem:[#allocation8 + $0xb4] ss:$8 sps:$4 sm:$0xff] (!%p1767_p1)   ;;  %v2775_v49 = vld [vmem:[#allocation8 + $0xb0] ss:$8 sps:$4 sm:$0xff] (!%p1767_p1)  }
  0xf9   : > { %2123 = vmatprep.subr.bf16.mxu0 %v2716_v50  ;;  %2187 = vmatprep.subr.bf16.mxu1 %v2718_v51  ;;  %v2776_v50 = vld [vmem:[#allocation8 + $0xc4] ss:$8 sps:$4 sm:$0xff] (!%p1767_p1)  }
  0xfa   : > { %v1913_v51 = vld [vmem:[#allocation9 + $0x40] sm:$0xff] (!%p1767_p1)  }
  0xfc   : > { %2125 = vmatpush1.bf16.msra.mxu0 %v2720_v52  ;;  %2189 = vmatpush1.bf16.msra.mxu1 %v2721_v53  ;;  %v1779_v52 = vld [vmem:[#allocation9] sm:$0xff] (!%p1767_p1)   ;;  %v1914_v53 = vld [vmem:[#allocation9 + $0x48] sm:$0xff] (!%p1767_p1)  }
  0xfd   : > { %2127 = vmatprep.subr.bf16.mxu0 %v2722_v54  ;;  %2191 = vmatprep.subr.bf16.mxu1 %v2724_v55  ;;  %v2778_v54 = vld [vmem:[#allocation8 + $0xc0] ss:$8 sps:$4 sm:$0xff] (!%p1767_p1)   ;;  %v860_v55 = vsub.s32 (!%p1767_p1), 0, %v3512_v25 }
 0x100   : > { %2129 = vmatpush1.bf16.msra.mxu0 %v2726_v56  ;;  %2193 = vmatpush1.bf16.msra.mxu1 %v2727_v57  ;;  %v2779_v56 = vld [vmem:[#allocation8 + $0xd4] ss:$8 sps:$4 sm:$0xff] (!%p1767_p1)   ;;  %v872_v57 = vsub.s32 (!%p1767_p1), 3, %v3512_v25 }
 0x101   : > { %2131 = vmatprep.subr.bf16.mxu0 %v2728_v58  ;;  %2195 = vmatprep.subr.bf16.mxu1 %v2730_v59  ;;  %v1906_v58 = vld [vmem:[#allocation9 + $0x8] sm:$0xff] (!%p1767_p1)   ;;  %v1915_v59 = vld [vmem:[#allocation9 + $0x50] sm:$0xff] (!%p1767_p1)  }
 0x102   : > { %v1922_v25 = vld [vmem:[#allocation11 + $0x10] sm:$0xff] (!%p1767_p1)  }
 0x104   : > { %2133 = vmatpush1.bf16.msra.mxu0 %v2732_v60  ;;  %2197 = vmatpush1.bf16.msra.mxu1 %v2733_v61  ;;  %v2781_v60 = vld [vmem:[#allocation8 + $0xd0] ss:$8 sps:$4 sm:$0xff] (!%p1767_p1)   ;;  %v861_v61 = vrot.slane (!%p1767_p1), %v856_v33, %v860_v55 }
 0x105   : > { %2135 = vmatprep.subr.bf16.mxu0 %v2734_v62  ;;  %2199 = vmatprep.subr.bf16.mxu1 %v2736_v63  ;;  %v2782_v62 = vld [vmem:[#allocation8 + $0xe4] ss:$8 sps:$4 sm:$0xff] (!%p1767_p1)  }
 0x108   : > { %2137 = vmatpush1.bf16.msra.mxu0 %v2738_v0  ;;  %2201 = vmatpush1.bf16.msra.mxu1 %v2739_v1  ;;  %v873_v0 = vrot.slane (!%p1767_p1), %v856_v33, %v872_v57  ;;  %v1907_v1 = vld [vmem:[#allocation9 + $0x10] sm:$0xff] (!%p1767_p1)   ;;  %v2808_v33 = vld [vmem:[#allocation8 + $0x160] ss:$8 sps:$4 sm:$0xff] (!%p1767_p1)  }
 0x109   : > { %2203 = vmatprep.subr.bf16.mxu0 (!%p1767_p1), %v2740_v15  ;;  %2331 = vmatprep.subr.bf16.mxu1 (!%p1767_p1), %v1913_v51  ;;  %v1918_v15 = vld [vmem:[#allocation9 + $0x68] sm:$0xff] (!%p1767_p1)  }
 0x10a   : > { %v2832_v51 = vld [vmem:[#allocation8 + $0x1e0] ss:$8 sps:$4 sm:$0xff] (!%p1767_p1)  }
 0x10b   : > { %763 = vmatmul.mubr.f32.vlgmr.msra.gmra.mrb[0].mxu0 %v504_v2  ;;  %834 = vmatmul.mubr.f32.vlgmr.msra.gmra.mrb[0].mxu1 %v504_v2 }
 0x10c   : > { %2205 = vmatpush1.bf16.msra.mxu0 (!%p1767_p1), %v2742_v16  ;;  %2333 = vmatpush3.bf16.msra.mxu1 (!%p1767_p1), %v1779_v52  ;;  %v2790_v16 = vld [vmem:[#allocation8 + $0x100] ss:$8 sps:$4 sm:$0xff] (!%p1767_p1)  }
 0x10d   : > { %2207 = vmatprep.subr.bf16.mxu0 (!%p1767_p1), %v2743_v17  ;;  %2335 = vmatprep.subr.bf16.mxu1 (!%p1767_p1), %v1914_v53  ;;  %v2833_v53 = vld [vmem:[#allocation8 + $0x1f4] ss:$8 sps:$4 sm:$0xff] (!%p1767_p1)  }
 0x110   : > { %2209 = vmatpush1.bf16.msra.mxu0 (!%p1767_p1), %v2745_v18  ;;  %2337 = vmatpush3.bf16.msra.mxu1 (!%p1767_p1), %v1906_v58  ;;  %v2791_v18 = vld [vmem:[#allocation8 + $0x114] ss:$8 sps:$4 sm:$0xff] (!%p1767_p1)  }
 0x111   : > { %2211 = vmatprep.subr.bf16.mxu0 (!%p1767_p1), %v2746_v19  ;;  %2339 = vmatprep.subr.bf16.mxu1 (!%p1767_p1), %v1915_v59  ;;  %v1919_v58 = vld [vmem:[#allocation9 + $0x70] sm:$0xff] (!%p1767_p1)  }
 0x112   : > { %v1911_v59 = vld [vmem:[#allocation9 + $0x30] sm:$0xff] (!%p1767_p1)  }
 0x114   : > { %2213 = vmatpush1.bf16.msra.mxu0 (!%p1767_p1), %v2748_v20  ;;  %2341 = vmatpush3.bf16.msra.mxu1 (!%p1767_p1), %v1907_v1  ;;  %v1910_v20 = vld [vmem:[#allocation9 + $0x28] sm:$0xff] (!%p1767_p1)  }
 0x115   : > { %2215 = vmatprep.subr.bf16.mxu0 (!%p1767_p1), %v2749_v21  ;;  %v2793_v21 = vld [vmem:[#allocation8 + $0x110] ss:$8 sps:$4 sm:$0xff] (!%p1767_p1)  }
 0x118   : > { %2217 = vmatpush1.bf16.msra.mxu0 (!%p1767_p1), %v2751_v23  ;;  %v2796_v23 = vld [vmem:[#allocation8 + $0x120] ss:$8 sps:$4 sm:$0xff] (!%p1767_p1)  }
 0x119   : > { %2219 = vmatprep.subr.bf16.mxu0 (!%p1767_p1), %v2752_v24  ;;  %v2797_v24 = vld [vmem:[#allocation8 + $0x134] ss:$8 sps:$4 sm:$0xff] (!%p1767_p1)  }
 0x11c   : > { %2221 = vmatpush1.bf16.msra.mxu0 (!%p1767_p1), %v2754_v26  ;;  %v2799_v26 = vld [vmem:[#allocation8 + $0x130] ss:$8 sps:$4 sm:$0xff] (!%p1767_p1)  }
 0x11d   : > { %2223 = vmatprep.subr.bf16.mxu0 (!%p1767_p1), %v2755_v27  ;;  %v2800_v27 = vld [vmem:[#allocation8 + $0x144] ss:$8 sps:$4 sm:$0xff] (!%p1767_p1)  }
 0x120   : > { %2225 = vmatpush1.bf16.msra.mxu0 (!%p1767_p1), %v2757_v30  ;;  %v2803_v30 = vld [vmem:[#allocation8 + $0x154] ss:$8 sps:$4 sm:$0xff] (!%p1767_p1)  }
 0x121   : > { %2227 = vmatprep.subr.bf16.mxu0 (!%p1767_p1), %v2758_v31  ;;  %v2805_v31 = vld [vmem:[#allocation8 + $0x150] ss:$8 sps:$4 sm:$0xff] (!%p1767_p1)  }
 0x124   : > { %2229 = vmatpush1.bf16.msra.mxu0 (!%p1767_p1), %v2760_v36  ;;  %v2811_v36 = vld [vmem:[#allocation8 + $0x170] ss:$8 sps:$4 sm:$0xff] (!%p1767_p1)  }
 0x125   : > { %2231 = vmatprep.subr.bf16.mxu0 (!%p1767_p1), %v2761_v37  ;;  %v2812_v37 = vld [vmem:[#allocation8 + $0x184] ss:$8 sps:$4 sm:$0xff] (!%p1767_p1)  }
 0x128   : > { %2233 = vmatpush1.bf16.msra.mxu0 (!%p1767_p1), %v2763_v40  ;;  %v2817_v40 = vld [vmem:[#allocation8 + $0x190] ss:$8 sps:$4 sm:$0xff] (!%p1767_p1)  }
 0x129   : > { %2235 = vmatprep.subr.bf16.mxu0 (!%p1767_p1), %v2764_v41  ;;  %v2818_v41 = vld [vmem:[#allocation8 + $0x1a4] ss:$8 sps:$4 sm:$0xff] (!%p1767_p1)  }
 0x12c   : > { %2237 = vmatpush1.bf16.msra.mxu0 (!%p1767_p1), %v2766_v43  ;;  %v2821_v43 = vld [vmem:[#allocation8 + $0x1b4] ss:$8 sps:$4 sm:$0xff] (!%p1767_p1)  }
 0x12d   : > { %2239 = vmatprep.subr.bf16.mxu0 (!%p1767_p1), %v2767_v44  ;;  %v2823_v44 = vld [vmem:[#allocation8 + $0x1b0] ss:$8 sps:$4 sm:$0xff] (!%p1767_p1)  }
 0x130   : > { %2241 = vmatpush1.bf16.msra.mxu0 (!%p1767_p1), %v2769_v45  ;;  %v2824_v45 = vld [vmem:[#allocation8 + $0x1c4] ss:$8 sps:$4 sm:$0xff] (!%p1767_p1)  }
 0x131   : > { %2243 = vmatprep.subr.bf16.mxu0 (!%p1767_p1), %v2770_v46  ;;  %v2826_v46 = vld [vmem:[#allocation8 + $0x1c0] ss:$8 sps:$4 sm:$0xff] (!%p1767_p1)  }
 0x134   : > { %2245 = vmatpush1.bf16.msra.mxu0 (!%p1767_p1), %v2772_v47  ;;  %v2827_v47 = vld [vmem:[#allocation8 + $0x1d4] ss:$8 sps:$4 sm:$0xff] (!%p1767_p1)  }
 0x135   : > { %2247 = vmatprep.subr.bf16.mxu0 (!%p1767_p1), %v2773_v48  ;;  %v2829_v48 = vld [vmem:[#allocation8 + $0x1d0] ss:$8 sps:$4 sm:$0xff] (!%p1767_p1)  }
 0x138   : > { %2249 = vmatpush1.bf16.msra.mxu0 (!%p1767_p1), %v2775_v49  ;;  %v2830_v49 = vld [vmem:[#allocation8 + $0x1e4] ss:$8 sps:$4 sm:$0xff] (!%p1767_p1)  }
 0x139   : > { %2251 = vmatprep.subr.bf16.mxu0 (!%p1767_p1), %v2776_v50 }
 0x13c   : > { %2253 = vmatpush1.bf16.msra.mxu0 (!%p1767_p1), %v2778_v54  ;;  %v2835_v54 = vld [vmem:[#allocation8 + $0x1f0] ss:$8 sps:$4 sm:$0xff] (!%p1767_p1)  }
 0x13d   : > { %2255 = vmatprep.subr.bf16.mxu0 (!%p1767_p1), %v2779_v56 }
 0x140   : > { %2257 = vmatpush1.bf16.msra.mxu0 (!%p1767_p1), %v2781_v60  ;;  %v1920_v60 = vld [vmem:[#allocation9 + $0x78] sm:$0xff] (!%p1767_p1)  }
 0x141   : > { %2259 = vmatprep.subr.bf16.mxu0 (!%p1767_p1), %v2782_v62  ;;  %v3107_v62 = vmov (!%p1767_p1), 0.0|0.0  }
 0x1dc   : > { %851 = sbr.rel (%p1767_p1) target bundleno = 1755 (0x6db), region = 96 }
 0x1de   : > { %v764_v7 = vpop.f32.mrb[0].mxu0  ;;  %v835_v8 = vpop.f32.mrb[0].mxu1 }
 0x1df   : > { %v840_v9 = vadd.f32 %v764_v7, %v500_v3  ;;  %v842_v10 = vadd.f32 %v835_v8, %v502_v4  ;;  %v766_v11 = vpop.f32.mrb[1].mxu0  ;;  %v837_v12 = vpop.f32.mrb[1].mxu1  ;;  %v1916_v3 = vld [vmem:[#allocation9 + $0x58] sm:$0xff] (!%p1767_p1)   ;;  %v2784_v4 = vld [vmem:[#allocation8 + $0xe0] ss:$8 sps:$4 sm:$0xff] (!%p1767_p1)  }
 0x1e0   : > { %v841_v13 = vadd.f32 %v766_v11, %v501_v5  ;;  %v843_v14 = vadd.f32 %v837_v12, %v503_v6  ;;  %v2785_v6 = vld [vmem:[#allocation8 + $0xf4] ss:$8 sps:$4 sm:$0xff] (!%p1767_p1)   ;;  %2343 = vmatprep.subr.bf16.mxu1 (!%p1767_p1), %v1916_v3  ;;  %2261 = vmatpush1.bf16.msra.mxu0 (!%p1767_p1), %v2784_v4  ;;  %v2788_v12 = vld [vmem:[#allocation8 + $0x104] ss:$8 sps:$4 sm:$0xff] (!%p1767_p1)  }
 0x1e1   : > { %844 = vst [vmem:[#allocation2] sm:$0xff] %v840_v9  ;;  %846 = vst [vmem:[#allocation2 + $0x10] sm:$0xff] %v842_v10  ;;  %v1908_v8 = vld [vmem:[#allocation9 + $0x18] sm:$0xff] (!%p1767_p1)   ;;  %v1917_v9 = vld [vmem:[#allocation9 + $0x60] sm:$0xff] (!%p1767_p1)   ;;  %2263 = vmatprep.subr.bf16.mxu0 (!%p1767_p1), %v2785_v6 }
 0x1e2   : > { %845 = vst [vmem:[#allocation2 + $0x8] sm:$0xff] %v841_v13  ;;  %847 = vst [vmem:[#allocation2 + $0x18] sm:$0xff] %v843_v14  ;;  %v2787_v10 = vld [vmem:[#allocation8 + $0xf0] ss:$8 sps:$4 sm:$0xff] (!%p1767_p1)   ;;  %2345 = vmatpush3.bf16.msra.mxu1 (!%p1767_p1), %v1908_v8  ;;  %v1909_v14 = vld [vmem:[#allocation9 + $0x20] sm:$0xff] (!%p1767_p1)  }
 0x1e3   : > { %2347 = vmatprep.subr.bf16.mxu1 %v1917_v9  ;;  %v1843_v8 = vld [vmem:[#allocation11] sm:$0xff]  }
 0x1e4   : > { %2265 = vmatpush1.bf16.msra.mxu0 %v2787_v10  ;;  %v1924_v10 = vld [vmem:[#allocation11 + $0x20] sm:$0xff]  }
 0x1e5   : > { %2267 = vmatprep.subr.bf16.mxu0 %v2788_v12  ;;  %v1926_v12 = vld [vmem:[#allocation11 + $0x30] sm:$0xff]  }
 0x1e6   : > { %2349 = vmatpush3.bf16.msra.mxu1 %v1909_v14  ;;  %v3109_v14 = vmov 0.0  }
 0x1e7   : > { %2351 = vmatprep.subr.bf16.mxu1 %v1918_v15 }
 0x1e8   : > { %v852_v63 = vld [vmem:[#allocation2] sm:$0xff]  ;;  %v854_v50 = vld [vmem:[#allocation2 + $0x10] sm:$0xff] }
 0x1e9   : > { %v853_v32 = vld [vmem:[#allocation2 + $0x8] sm:$0xff]  ;;  %v855_v2 = vld [vmem:[#allocation2 + $0x18] sm:$0xff]  ;;  %v878_v5 = vadd.f32 %v861_v61, %v852_v63  ;;  %v880_v52 = vadd.f32 %v3521_v35, %v854_v50  ;;  %v1086_v35 = vld [vmem:[%s3600_s4] sm:$0x3] }
 0x1ea   : > { %v879_v38 = vadd.f32 %v865_v34, %v853_v32  ;;  %v881_v7 = vadd.f32 %v873_v0, %v855_v2  ;;  %2353 = vmatpush3.bf16.msra.mxu1 %v1910_v20  ;;  %v2806_v32 = vld [vmem:[#allocation8 + $0x164] ss:$8 sps:$4 sm:$0xff]   ;;  %v2809_v34 = vld [vmem:[#allocation8 + $0x174] ss:$8 sps:$4 sm:$0xff]   ;;  %v1091_v63 = vrot.slane %v1086_v35, %v860_v55  ;;  %v1095_v0 = vrot.slane %v1086_v35, %v864_v28 }
 0x1eb   : > { %v886_v11 = vmul.f32 0.01, %v878_v5  ;;  %vm882_vm1 = vcmp.ge.f32.partialorder %v878_v5, 0.0  ;;  %v888_v56 = vmul.f32 0.01, %v880_v52  ;;  %vm884_vm3 = vcmp.ge.f32.partialorder %v880_v52, 0.0  ;;  %2355 = vmatprep.subr.bf16.mxu1 %v1919_v58 }
 0x1ec   : > { %vm883_vm0 = vcmp.ge.f32.partialorder %v879_v38, 0.0  ;;  %v887_v39 = vmul.f32 0.01, %v879_v38  ;;  %v889_v13 = vmul.f32 0.01, %v881_v7  ;;  %vm885_vm2 = vcmp.ge.f32.partialorder %v881_v7, 0.0 }
 0x1ed   : > { %v890_v17 = vsel %vm882_vm1, %v878_v5, %v886_v11  ;;  %v892_v57 = vsel %vm884_vm3, %v880_v52, %v888_v56  ;;  %v1912_v61 = vld [vmem:[#allocation9 + $0x38] sm:$0xff]   ;;  %v1921_v55 = vld [vmem:[#allocation11 + $0x8] sm:$0xff]  }
 0x1ee   : > { %v891_v42 = vsel %vm883_vm0, %v879_v38, %v887_v39  ;;  %v893_v19 = vsel %vm885_vm2, %v881_v7, %v889_v13  ;;  %v2814_v38 = vld [vmem:[#allocation8 + $0x180] ss:$8 sps:$4 sm:$0xff]   ;;  %v2815_v39 = vld [vmem:[#allocation8 + $0x194] ss:$8 sps:$4 sm:$0xff]   ;;  %2357 = vmatpush3.bf16.msra.mxu1 %v1911_v59 }
 0x1ef   : > { %1162 = vmatprep.mubr.f32.mxu0 %v891_v42  ;;  %v2820_v42 = vld [vmem:[#allocation8 + $0x1a0] ss:$8 sps:$4 sm:$0xff]   ;;  %2359 = vmatprep.subr.bf16.mxu1 %v1920_v60  ;;  %v1923_v28 = vld [vmem:[#allocation11 + $0x18] sm:$0xff]  }
 0x1f0   : > { %1163 = vmatmul.mubr.f32.vlgmr.msra.gmra.mrb[0].mxu0 %v890_v17  ;;  %v1925_v11 = vld [vmem:[#allocation11 + $0x28] sm:$0xff]   ;;  %v1927_v13 = vld [vmem:[#allocation11 + $0x38] sm:$0xff]  }
 0x1f1   : > { %2269 = vmatpush1.bf16.msra.mxu0 %v2790_v16  ;;  %1233 = vmatprep.mubr.f32.mxu0 %v893_v19  ;;  %v1768_v16 = vld [vmem:[%s3602_s6] ss:$0 sm:$0xff] }
 0x1f2   : > { %2271 = vmatprep.subr.bf16.mxu0 %v2791_v18  ;;  %2361 = vmatpush3.bf16.msra.mxu1 %v1912_v61 }
 0x1f3   : > { %2362 = vmatprep.subr.bf16.mxu1 %v3107_v62 }
 0x1f5   : > { %2273 = vmatpush1.bf16.msra.mxu0 %v2793_v21  ;;  %v1875_v21 = vld [vmem:[#allocation12] sm:$0xff]  }
 0x1f6   : > { %2275 = vmatprep.subr.bf16.mxu0 %v2794_v22 }
 0x1f9   : > { %2277 = vmatpush1.bf16.msra.mxu0 %v2796_v23  ;;  %v1928_v23 = vld [vmem:[#allocation12 + $0x8] sm:$0xff]  }
 0x1fa   : > { %2279 = vmatprep.subr.bf16.mxu0 %v2797_v24  ;;  %v1929_v24 = vld [vmem:[#allocation12 + $0x10] sm:$0xff]  }
 0x1fd   : > { %2281 = vmatpush1.bf16.msra.mxu0 %v2799_v26  ;;  %v1930_v26 = vld [vmem:[#allocation12 + $0x18] sm:$0xff]  }
 0x1fe   : > { %2283 = vmatprep.subr.bf16.mxu0 %v2800_v27  ;;  %v1931_v27 = vld [vmem:[#allocation12 + $0x20] sm:$0xff]  }
 0x201   : > { %2285 = vmatpush1.bf16.msra.mxu0 %v2802_v29  ;;  %v1932_v29 = vld [vmem:[#allocation12 + $0x28] sm:$0xff]  }
 0x202   : > { %2287 = vmatprep.subr.bf16.mxu0 %v2803_v30  ;;  %v1933_v30 = vld [vmem:[#allocation12 + $0x30] sm:$0xff]  }
 0x205   : > { %2289 = vmatpush1.bf16.msra.mxu0 %v2805_v31  ;;  %v1934_v31 = vld [vmem:[#allocation12 + $0x38] sm:$0xff]  }
 0x206   : > { %2291 = vmatprep.subr.bf16.mxu0 %v2806_v32  ;;  %v1769_v32 = vld [vmem:[%s3630_s0] ss:$0 sm:$0xff] }
 0x209   : > { %2293 = vmatpush1.bf16.msra.mxu0 %v2808_v33 }
 0x20a   : > { %2295 = vmatprep.subr.bf16.mxu0 %v2809_v34 }
 0x20d   : > { %2297 = vmatpush1.bf16.msra.mxu0 %v2811_v36 }
 0x20e   : > { %2299 = vmatprep.subr.bf16.mxu0 %v2812_v37 }
 0x211   : > { %2301 = vmatpush1.bf16.msra.mxu0 %v2814_v38 }
 0x212   : > { %2303 = vmatprep.subr.bf16.mxu0 %v2815_v39  ;;  %v1770_v39 = vld [vmem:[%s3631_s15] ss:$0 sm:$0xff] }
 0x215   : > { %2305 = vmatpush1.bf16.msra.mxu0 %v2817_v40 }
 0x216   : > { %2307 = vmatprep.subr.bf16.mxu0 %v2818_v41 }
 0x219   : > { %2309 = vmatpush1.bf16.msra.mxu0 %v2820_v42 }
 0x21a   : > { %2311 = vmatprep.subr.bf16.mxu0 %v2821_v43 }
 0x21d   : > { %2313 = vmatpush1.bf16.msra.mxu0 %v2823_v44 }
 0x21e   : > { %2315 = vmatprep.subr.bf16.mxu0 %v2824_v45 }
 0x221   : > { %2317 = vmatpush1.bf16.msra.mxu0 %v2826_v46 }
 0x222   : > { %2319 = vmatprep.subr.bf16.mxu0 %v2827_v47 }
 0x225   : > { %2321 = vmatpush1.bf16.msra.mxu0 %v2829_v48 }
 0x226   : > { %2323 = vmatprep.subr.bf16.mxu0 %v2830_v49 }
 0x229   : > { %2325 = vmatpush1.bf16.msra.mxu0 %v2832_v51 }
 0x22a   : > { %2327 = vmatprep.subr.bf16.mxu0 %v2833_v53 }
 0x22d   : > { %2329 = vmatpush1.bf16.msra.mxu0 %v2835_v54 }
 0x230   : > { %1234 = vmatmul.mubr.f32.vlgmr.msra.gmra.mrb[0].mxu0 %v892_v57 }
 0x303   : > { %v1235_v1 = vpop.f32.mrb[0].mxu0 }
 0x304   : > { %v2410_v2 = vadd.f32 %v1235_v1, %v1091_v63  ;;  %v1237_v3 = vpop.f32.mrb[1].mxu0 }
 0x305   : > { %v2411_v4 = vadd.f32 %v1237_v3, %v1095_v0 }
 0x306   : > { %v1242_v5 = vmul.f32 0.01, %v2410_v2  ;;  %vm1240_vm5 = vcmp.ge.f32.partialorder %v2410_v2, 0.0 }
 0x307   : > { %vm1241_vm4 = vcmp.ge.f32.partialorder %v2411_v4, 0.0  ;;  %v1243_v6 = vmul.f32 0.01, %v2411_v4 }
 0x308   : > { %v1244_v9 = vsel %vm1240_vm5, %v2410_v2, %v1242_v5 }
 0x309   : > { %v1245_v7 = vsel %vm1241_vm4, %v2411_v4, %v1243_v6 }
 0x30a   : > { %1381 = vmatprep.mubr.f32.mxu1 %v1245_v7 }
 0x30b   : > { %1382 = vmatmul.mubr.f32.vlgmr.msra.gmra.mrb[0].mxu1 %v1244_v9 }
 0x30c   : > { %2364 = vmatpush3.bf16.msra.mxu1 %v1843_v8  ;;  %2036 = vmatprep.mubr.msk.f32.mxu1 %vm3108_vm6, %v3109_v14 }
 0x30d   : > { %2365 = vmatprep.subr.bf16.mxu1 %v3107_v62 }
 0x310   : > { %2367 = vmatpush3.bf16.msra.mxu1 %v1921_v55 }
 0x311   : > { %2368 = vmatprep.subr.bf16.mxu1 %v3107_v62 }
 0x314   : > { %2370 = vmatpush3.bf16.msra.mxu1 %v1922_v25 }
 0x315   : > { %2371 = vmatprep.subr.bf16.mxu1 %v3107_v62 }
 0x318   : > { %2373 = vmatpush3.bf16.msra.mxu1 %v1923_v28 }
 0x319   : > { %2374 = vmatprep.subr.bf16.mxu1 %v3107_v62 }
 0x31c   : > { %2376 = vmatpush3.bf16.msra.mxu1 %v1924_v10 }
 0x31d   : > { %2377 = vmatprep.subr.bf16.mxu1 %v3107_v62 }
 0x320   : > { %2379 = vmatpush3.bf16.msra.mxu1 %v1925_v11 }
 0x321   : > { %2380 = vmatprep.subr.bf16.mxu1 %v3107_v62 }
 0x324   : > { %2382 = vmatpush3.bf16.msra.mxu1 %v1926_v12 }
 0x325   : > { %2383 = vmatprep.subr.bf16.mxu1 %v3107_v62 }
 0x328   : > { %2385 = vmatpush3.bf16.msra.mxu1 %v1927_v13 }
 0x329   : > { %2386 = vmatprep.subr.bf16.mxu1 %v3107_v62 }
 0x3de   : > { %v1967_v15 = vpop.f32.mrb[0].mxu1 }
 0x3df   : > { %v1968_v17 = vpop.f32.mrb[1].mxu1 }
 0x3e0   : > { %v1969_v18 = vadd.f32 %v1968_v17, %v1967_v15 }
 0x3e2   : > { %v1384_v19 = vadd.f32 %v1969_v18, %v1768_v16 }
 0x3e4   : > { %v1388_v20 = vmul.f32 0.01, %v1384_v19  ;;  %vm1387_vm7 = vcmp.ge.f32.partialorder %v1384_v19, 0.0 }
 0x3e6   : > { %v1389_v22 = vsel %vm1387_vm7, %v1384_v19, %v1388_v20 }
 0x3e7   : > { %2037 = vmatmul.mubr.f32.vlgmr.msra.gmra.mrb[2].mxu1 %v1389_v22 }
 0x3e8   : > { %2388 = vmatpush3.bf16.msra.mxu1 %v1875_v21  ;;  %2071 = vmatprep.mubr.msk.f32.mxu1 %vm3108_vm6, %v3109_v14 }
 0x3e9   : > { %2389 = vmatprep.subr.bf16.mxu1 %v3107_v62 }
 0x3ec   : > { %2391 = vmatpush3.bf16.msra.mxu1 %v1928_v23 }
 0x3ed   : > { %2392 = vmatprep.subr.bf16.mxu1 %v3107_v62 }
 0x3f0   : > { %2394 = vmatpush3.bf16.msra.mxu1 %v1929_v24 }
 0x3f1   : > { %2395 = vmatprep.subr.bf16.mxu1 %v3107_v62 }
 0x3f4   : > { %2397 = vmatpush3.bf16.msra.mxu1 %v1930_v26 }
 0x3f5   : > { %2398 = vmatprep.subr.bf16.mxu1 %v3107_v62 }
 0x3f8   : > { %2400 = vmatpush3.bf16.msra.mxu1 %v1931_v27 }
 0x3f9   : > { %2401 = vmatprep.subr.bf16.mxu1 %v3107_v62 }
 0x3fc   : > { %2403 = vmatpush3.bf16.msra.mxu1 %v1932_v29 }
 0x3fd   : > { %2404 = vmatprep.subr.bf16.mxu1 %v3107_v62 }
 0x400   : > { %2406 = vmatpush3.bf16.msra.mxu1 %v1933_v30 }
 0x401   : > { %2407 = vmatprep.subr.bf16.mxu1 %v3107_v62 }
 0x404   : > { %2409 = vmatpush3.bf16.msra.mxu1 %v1934_v31 }
 0x4ba   : > { %v1495_v33 = vpop.f32.mrb[2].mxu1 }
 0x4bb   : > { %v1496_v34 = vadd.f32 %v1769_v32, %v1495_v33  ;;  %v2038_v36 = vpop.f32.mrb[3].mxu1 }
 0x4bd   : > { %vm1499_vm8 = vcmp.ge.f32.partialorder %v1496_v34, 0.0  ;;  %v1500_v37 = vmul.f32 0.01, %v1496_v34 }
 0x4bf   : > { %v1501_v38 = vsel %vm1499_vm8, %v1496_v34, %v1500_v37 }
 0x4c0   : > { %2072 = vmatmul.mubr.f32.vlgmr.msra.gmra.mrb[4].mxu1 %v1501_v38 }
 0x593   : > { %v1607_v40 = vpop.f32.mrb[4].mxu1 }
 0x594   : > { %v1608_v41 = vadd.f32 %v1770_v39, %v1607_v40  ;;  %v2073_v42 = vpop.f32.mrb[5].mxu1 }
 0x596   : > { %1611 = vmax.xlane.f32.xlu0 %v1608_v41 }
 0x623   : > { %v1612_v43 = vpop.xlane.xlu0 %1611 }
 0x624   : > { %v1613_v44 = vsub.f32 %v1608_v41, %v1612_v43 }
 0x626   : > { %v1614_v45 = vmul.f32 1.442695, %v1613_v44 }
 0x628   : > { %2836 = vpow2.f32 %v1614_v45 }
 0x632   : > { %v2837_v46 = vpop.eup %2836 }
 0x633   : > { %1616 = vadd.xlane.f32.xlu0 %v2837_v46 }
 0x6c0   : > { %v1617_v47 = vpop.xlane.xlu0 %1616 }
 0x6c1   : > { %2838 = vrcp.f32 %v1617_v47 }
 0x6cb   : > { %v2839_v48 = vpop.eup %2838 }
 0x6cc   : > { %v1619_v49 = vmul.f32 %v2839_v48, %v1617_v47 }
 0x6ce   : > { %v1620_v50 = vsub.f32 2.0, %v1619_v49 }
 0x6d0   : > { %v1621_v51 = vmul.f32 %v2839_v48, %v1620_v50 }
 0x6d2   : > { %v1622_v52 = vmul.f32 %v1621_v51, %v1617_v47 }
 0x6d4   : > { %v1623_v53 = vsub.f32 2.0, %v1622_v52 }
 0x6d6   : > { %v1624_v54 = vmul.f32 %v1623_v53, %v1621_v51 }
 0x6d8   : > { %v1625_v56 = vmul.f32 %v2837_v46, %v1624_v54 }
 0x6da   : > { %1626 = vst [vmem:[#allocation14] sm:$0xff] %v1625_v56 }
 0x6db PF: > { %p2595_p3 = scmp.eq.s32.totalorder %s3192_s23, 3  ;;  %s3110_s17 = smov [#allocation14]  }
 0x6dc   : > { %s1634_s20 = sshll.u32 %s3110_s17, 4  ;;  %s1635_s20 = int_to_ptr.vmem [resolvable:$true] %s1634_s20 }
 0x6dd   : > { %s3012_s28 = scalar_lea.vmem %s1635_s20, 128  ;;  %p3019_p0 = scmp.lt.s32.totalorder %s1635_s20, %s1635_s20 }
 0x6de   : > { %p3013_p4 = scmp.ne.s32.totalorder %s1635_s20, %s3012_s28  ;;  %p3020_p7 = scmp.lt.s32.totalorder %s3012_s28, %s3012_s28 }
 0x6e0   : > { %p3014_p12 = pnand %p3013_p4, %p2595_p3  ;;  %p3021_p6 = por %p3020_p7, %p3019_p0 }
 0x6e2   : > { %p3015_p13 = pneg %p3014_p12 }
 0x6e4   : > { %p3022_p11 = pnand %p3021_p6, %p3015_p13 }
 0x6e6   : > { %3025 = shalt.err (!%p3022_p11)
}
 0x6e7   : > { %s3632_s16 = sld [smem:[#allocation24_spill]] }
 0x6ed   : > { %s3026_s24 = scalar_lea.hbm %s3632_s16, 128 }
 0x6ee   : > { %p3027_p5 = scmp.ne.s32.totalorder %s3632_s16, %s3026_s24  ;;  %p3032_p8 = scmp.lt.u32.totalorder %s3026_s24, %s3632_s16 }
 0x6f0   : > { %p3028_p9 = pnand %p3027_p5, %p2595_p3 }
 0x6f2   : > { %p3029_p10 = pneg %p3028_p9 }
 0x6f4   : > { %p3034_p2 = pnand %p3032_p8, %p3029_p10 }
 0x6f6   : > { %3037 = shalt.err (!%p3034_p2)
}
 0x6f7   : > { %2563 = dma.vmem_to_hbm [thread:$0]  (%p2595_p3), %s1635_s20, 128, %s3632_s16, [#allocation5]  }
 0x6f8   : > { %3075 = dma.done.wait (%p2595_p3), [#allocation5], 128  }
 0x6f9   : > { %3077 = vsyncadd (%p2595_p3), [#allocation5], 4294967168 }
 0x6fa PF: > { %p27_p1 = scmp.ge.s32.totalorder %s3315_s27, 6   ;;  %s3633_s17 = smov %s3084_s18 }
 0x6fb   : > { %s3634_s18 = smov %s3088_s19  ;;  %s3635_s19 = smov %s3327_s13 }
 0x6fc   : > { %s3636_s20 = smov %s3315_s27  ;;  %29 = sbr.rel (!%p27_p1) target bundleno = 13 (0xd), region = 138 }
 0x703   :  { %1647 = vsyncpa [#allocation4], 1 }
 0x704   :  { %1649 = vsyncpa [#allocation4 + $0x1], 1 }
 0x705   :  { %1650 = vsyncpa [#allocation7], 1 }
 0x706   :  { %1652 = vsyncpa [#allocation7 + $0x1], 1 }
 0x707   :  { %1653 = vsyncpa [#allocation10], 1 }
 0x708   :  { %1654 = vsyncpa [#allocation13], 1 }
 0x709   :  { %1655 = vsyncpa [#allocation5], 1 }
 0x70a   :  { %1657 = vsyncpa [#allocation5 + $0x1], 1 }

</bundles_post_ra>
